<compile_context>
chip_gen: v7x
topology: tpu7x:2x2x1
jax: 0.10.0
libtpu: 0.0.40
codegen_flags: <defaults>
</compile_context>

<pallas_src>
import math

import jax
import jax.numpy as jnp
from jax.experimental import pallas as pl
from jax.experimental.pallas import tpu as pltpu


def _sggnn_kernel(qf_ref, gf_ref, w1_ref, w2_ref, pp_ref, out_ref):
    TB, N, D = gf_ref.shape
    gf = gf_ref[...]                                   # (TB, N, D) f32
    qf = qf_ref[...]                                   # (TB, 1, D) f32
    pp = pp_ref[...]                                   # (4, D) f32: [b1', b2', wcd, bcd]
    b1 = pp[0:1, :]                                    # (1, D)
    b2 = pp[1:2, :]                                    # (1, D)
    wcd = pp[2:3, :].reshape(1, 1, D)                  # classifier direction wc[1]-wc[0]
    bcd = pp[3:4, 0:1]                                 # bc[1]-bc[0]

    # d[b, n, :] = (qf[b] - gf[b, n])**2   (the siamese "verification" feature)
    d = (qf - gf) ** 2                                 # (TB, N, D)

    # Classifier direction applied directly to d (avoids forming d_new later).
    dv = jnp.sum(d * wcd, axis=-1)                     # (TB, N)

    # ReFineBlock: 2 x [Linear -> BatchNorm1d(eval, folded) -> LeakyReLU(0.1) -> Dropout(id)]
    # Batched over TB queries so the MXU sees M = TB*N rows; bf16 inputs, f32 accumulation.
    # TODO(synk): training-mode BatchNorm (batch stats) and Dropout randomness not modeled.
    d2 = d.reshape(TB * N, D).astype(jnp.bfloat16)
    h = jnp.dot(d2, w1_ref[...], preferred_element_type=jnp.float32) + b1
    h = jnp.maximum(h, 0.1 * h)                        # LeakyReLU(0.1)
    h = jnp.dot(h.astype(jnp.bfloat16), w2_ref[...], preferred_element_type=jnp.float32) + b2
    t = jnp.maximum(h, 0.1 * h)                        # (TB*N, D) f32
    tv = jnp.sum(t.reshape(TB, N, D) * wcd, axis=-1)   # (TB, N)

    # Adjacency w[b,i,j] = exp(-||gf[b,i]-gf[b,j]||^2) via Gram identity (no (N,N,D) tensor).
    gram = jnp.einsum("bnd,bmd->bnm", gf, gf,
                      preferred_element_type=jnp.float32)             # (TB, N, N)
    g2 = jnp.sum(gf * gf, axis=-1)                                    # (TB, N)
    dist = jnp.maximum(g2[:, :, None] + g2[:, None, :] - 2.0 * gram, 0.0)
    w = jnp.exp(-dist)                                                # (TB, N, N)

    # preprocess_sggnn_adj: softmax over dim 1 (the "k" axis) of (w - 100*w*eye)
    row = jax.lax.broadcasted_iota(jnp.int32, (N, N), 0)
    col = jax.lax.broadcasted_iota(jnp.int32, (N, N), 1)
    diag = (row == col)[None, :, :]                                   # (1, N, N)
    adj = jnp.where(diag, -99.0 * w, w)
    adj = adj - jnp.max(adj, axis=1, keepdims=True)
    e = jnp.exp(adj)
    w_norm = e / jnp.sum(e, axis=1, keepdims=True)                    # (TB, N, N)

    # logit[b,n] = <0.1 * sum_k w_norm[b,k,n] t[b,k] + 0.9 d[b,n], wcd> + bcd
    prop = jnp.sum(w_norm * tv[:, :, None], axis=1)                   # (TB, N)
    logit = 0.1 * prop + 0.9 * dv + bcd
    # 2-class softmax -> p(class=1) = sigmoid(logit1 - logit0)
    out_ref[...] = jax.nn.sigmoid(logit)


def init_params(key, d_model=512, num_classes=2):
    """Raw (PyTorch-style) parameters of the ReFineBlock + classifier."""
    ks = jax.random.split(key, 5)
    std_k = math.sqrt(2.0 / d_model)              # kaiming_normal_, fan_out, a=0
    w1 = jax.random.normal(ks[0], (d_model, d_model), jnp.float32) * std_k   # (out, in)
    w2 = jax.random.normal(ks[1], (d_model, d_model), jnp.float32) * std_k
    g1 = 1.0 + 0.02 * jax.random.normal(ks[2], (d_model,), jnp.float32)
    g2 = 1.0 + 0.02 * jax.random.normal(ks[3], (d_model,), jnp.float32)
    wc = jax.random.normal(ks[4], (num_classes, d_model), jnp.float32) * 0.001
    return {
        "w1": w1, "b1": jnp.zeros((d_model,), jnp.float32),
        "g1": g1, "beta1": jnp.zeros((d_model,), jnp.float32),
        "w2": w2, "b2": jnp.zeros((d_model,), jnp.float32),
        "g2": g2, "beta2": jnp.zeros((d_model,), jnp.float32),
        "wc": wc, "bc": jnp.zeros((num_classes,), jnp.float32),
    }


def fold_params(p, eps=1e-5):
    """Fold eval-mode BN (running_mean=0, running_var=1) and biases into the Linear weights."""
    s1 = p["g1"] / jnp.sqrt(1.0 + eps)
    s2 = p["g2"] / jnp.sqrt(1.0 + eps)
    w1f = (p["w1"].T * s1[None, :]).astype(jnp.bfloat16)   # (in, out), per-output column scale
    w2f = (p["w2"].T * s2[None, :]).astype(jnp.bfloat16)
    b1f = p["b1"] * s1 + p["beta1"]
    b2f = p["b2"] * s2 + p["beta2"]
    wcd = p["wc"][1] - p["wc"][0]
    bcd = p["bc"][1] - p["bc"][0]
    D = p["w1"].shape[0]
    pp = jnp.stack([b1f, b2f, wcd, jnp.full((D,), bcd, jnp.float32)], axis=0)   # (4, D)
    return {"w1f": w1f, "w2f": w2f, "pp": pp.astype(jnp.float32)}


def sggnn_forward(qf, gf, kp, tb=32):
    B, N, D = gf.shape
    TB = min(tb, B)                 # TB=32 -> M = 256 rows per MXU matmul (v6e/v7x tile)
    G = pl.cdiv(B, TB)              # grid over query blocks; "parallel" -> megacore shards it
    Bp = G * TB

    qf3 = qf.reshape(B, 1, D)
    gfp = gf
    if Bp != B:                     # zero padding is benign for every op in the kernel
        qf3 = jnp.pad(qf3, ((0, Bp - B), (0, 0), (0, 0)))
        gfp = jnp.pad(gfp, ((0, Bp - B), (0, 0), (0, 0)))

    const2 = lambda i: (0, 0)
    grid_spec = pltpu.PrefetchScalarGridSpec(
        num_scalar_prefetch=0,
        grid=(G,),
        in_specs=[
            pl.BlockSpec((TB, 1, D), lambda i: (i, 0, 0)),   # qf
            pl.BlockSpec((TB, N, D), lambda i: (i, 0, 0)),   # gf
            pl.BlockSpec((D, D), const2),                    # folded W1 (bf16)
            pl.BlockSpec((D, D), const2),                    # folded W2 (bf16)
            pl.BlockSpec((4, D), const2),                    # packed [b1', b2', wcd, bcd]
        ],
        out_specs=pl.BlockSpec((TB, N), lambda i: (i, 0)),
    )
    probs = pl.pallas_call(
        _sggnn_kernel,
        out_shape=jax.ShapeDtypeStruct((Bp, N), jnp.float32),
        grid_spec=grid_spec,
        compiler_params=pltpu.CompilerParams(dimension_semantics=("parallel",)),
    )(qf3, gfp, kp["w1f"], kp["w2f"], kp["pp"])

    result = probs[:B]                                  # (B, N) p(class=1)
    index = jnp.argsort(-result, axis=-1)               # torch.sort(..., descending=True) indices
    return index, result


def reference(qf, gf, p, eps=1e-5):
    """Pure-JAX fp32 reference with the original (unfolded) semantics."""
    hp = jax.lax.Precision.HIGHEST
    d = (qf[:, None, :] - gf) ** 2                      # (B, N, D)
    diff = gf[:, :, None, :] - gf[:, None, :, :]
    w = jnp.exp(-jnp.sum(diff * diff, axis=-1))         # (B, N, N)
    bn_scale = 1.0 / jnp.sqrt(1.0 + eps)

    def layer(x, wgt, b, g, beta):
        h = jnp.einsum("bnd,od->bno", x, wgt, precision=hp) + b
        h = g * bn_scale * h + beta
        return jnp.where(h > 0, h, 0.1 * h)

    t = layer(layer(d, p["w1"], p["b1"], p["g1"], p["beta1"]),
              p["w2"], p["b2"], p["g2"], p["beta2"])
    eye = jnp.eye(gf.shape[1], dtype=w.dtype)
    adj = w - 100.0 * w * eye[None]
    w_norm = jax.nn.softmax(adj, axis=1)
    d_new = 0.1 * jnp.einsum("bkn,bkd->bnd", w_norm, t, precision=hp) + 0.9 * d
    logits = jnp.einsum("bnd,cd->bnc", d_new, p["wc"], precision=hp) + p["bc"]
    return jax.nn.softmax(logits, axis=-1)[..., -1]


if __name__ == "__main__":
    B, N, D = 2, 8, 512
    key = jax.random.PRNGKey(0)
    kq, kg, kparam = jax.random.split(key, 3)
    qf = 0.05 * jax.random.normal(kq, (B, D), jnp.float32)
    gf = 0.05 * jax.random.normal(kg, (B, N, D), jnp.float32)
    raw_params = init_params(kparam, D, 2)
    kernel_params = fold_params(raw_params)

    index, result = jax.jit(sggnn_forward)(qf, gf, kernel_params)
    jax.block_until_ready((index, result))

    ref = reference(qf, gf, raw_params)
    assert index.shape == (B, N)
    err = float(jnp.max(jnp.abs(result - ref)))
    assert bool(jnp.allclose(result, ref, atol=5e-3, rtol=1e-3)), f"max abs err {err}"
    print("KERNEL_OK")
</pallas_src>

<mosaic_0001>
module attributes {stable_mosaic.version = 11 : i64} {
  func.func @_sggnn_kernel(%arg0: i32, %arg1: memref<2x1x512xf32, #tpu.memory_space<vmem>>, %arg2: memref<2x8x512xf32, #tpu.memory_space<vmem>>, %arg3: memref<512x512xbf16, #tpu.memory_space<vmem>>, %arg4: memref<512x512xbf16, #tpu.memory_space<vmem>>, %arg5: memref<4x512xf32, #tpu.memory_space<vmem>>, %arg6: memref<2x8xf32, #tpu.memory_space<vmem>>) attributes {dimension_semantics = [#tpu.dimension_semantics<parallel>], iteration_bounds = array<i64: 1>, scalar_prefetch = 0 : i64, scratch_operands = 0 : i64, tpu.core_type = #tpu.core_type<tc>, window_params = [{transform_indices = @transform_0, window_bounds = array<i64: 2, 1, 512>}, {transform_indices = @transform_1, window_bounds = array<i64: 2, 8, 512>}, {pipeline_mode = #tpu.pipeline_mode<synchronous>, transform_indices = @transform_2, window_bounds = array<i64: 512, 512>}, {pipeline_mode = #tpu.pipeline_mode<synchronous>, transform_indices = @transform_3, window_bounds = array<i64: 512, 512>}, {pipeline_mode = #tpu.pipeline_mode<synchronous>, transform_indices = @transform_4, window_bounds = array<i64: 4, 512>}, {transform_indices = @transform_5, window_bounds = array<i64: 2, 8>}]} {
    %c0 = arith.constant 0 : index
    %c0_0 = arith.constant 0 : index
    %c0_1 = arith.constant 0 : index
    %0 = vector.load %arg2[%c0, %c0_0, %c0_1] : memref<2x8x512xf32, #tpu.memory_space<vmem>>, vector<2x8x512xf32>
    %c0_2 = arith.constant 0 : index
    %c0_3 = arith.constant 0 : index
    %c0_4 = arith.constant 0 : index
    %1 = vector.load %arg1[%c0_2, %c0_3, %c0_4] : memref<2x1x512xf32, #tpu.memory_space<vmem>>, vector<2x1x512xf32>
    %c0_5 = arith.constant 0 : index
    %c0_6 = arith.constant 0 : index
    %2 = vector.load %arg5[%c0_5, %c0_6] : memref<4x512xf32, #tpu.memory_space<vmem>>, vector<4x512xf32>
    %3 = vector.extract_strided_slice %2 {offsets = [0, 0], sizes = [1, 512], strides = [1, 1]} : vector<4x512xf32> to vector<1x512xf32>
    %4 = vector.extract_strided_slice %2 {offsets = [1, 0], sizes = [1, 512], strides = [1, 1]} : vector<4x512xf32> to vector<1x512xf32>
    %5 = vector.extract_strided_slice %2 {offsets = [2, 0], sizes = [1, 512], strides = [1, 1]} : vector<4x512xf32> to vector<1x512xf32>
    %6 = vector.shape_cast %5 : vector<1x512xf32> to vector<1x1x512xf32>
    %7 = vector.extract_strided_slice %2 {offsets = [3, 0], sizes = [1, 1], strides = [1, 1]} : vector<4x512xf32> to vector<1x1xf32>
    %8 = vector.broadcast %1 : vector<2x1x512xf32> to vector<2x8x512xf32>
    %9 = arith.subf %8, %0 : vector<2x8x512xf32>
    %10 = arith.mulf %9, %9 : vector<2x8x512xf32>
    %11 = vector.broadcast %6 : vector<1x1x512xf32> to vector<2x8x512xf32>
    %12 = arith.mulf %10, %11 : vector<2x8x512xf32>
    %cst = arith.constant dense<0.000000e+00> : vector<2x8xf32>
    %13 = vector.multi_reduction <add>, %12, %cst [2] : vector<2x8x512xf32> to vector<2x8xf32>
    %14 = vector.shape_cast %10 : vector<2x8x512xf32> to vector<16x512xf32>
    %15 = arith.truncf %14 : vector<16x512xf32> to vector<16x512xbf16>
    %c0_7 = arith.constant 0 : index
    %c0_8 = arith.constant 0 : index
    %16 = vector.load %arg3[%c0_7, %c0_8] : memref<512x512xbf16, #tpu.memory_space<vmem>>, vector<512x512xbf16>
    %cst_9 = arith.constant dense<0.000000e+00> : vector<16x512xf32>
    %17 = tpu.matmul %15, %16, %cst_9 {dimension_numbers = #tpu.dot_dimension_numbers<[1], [0], [0], [1], [0, 0, 1, 1], [], []>} : vector<16x512xbf16>, vector<512x512xbf16>, vector<16x512xf32> -> vector<16x512xf32>
    %18 = vector.broadcast %3 : vector<1x512xf32> to vector<16x512xf32>
    %19 = arith.addf %17, %18 : vector<16x512xf32>
    %cst_10 = arith.constant 1.000000e-01 : f32
    %20 = vector.broadcast %cst_10 : f32 to vector<16x512xf32>
    %21 = arith.mulf %20, %19 : vector<16x512xf32>
    %22 = arith.maximumf %19, %21 : vector<16x512xf32>
    %23 = arith.truncf %22 : vector<16x512xf32> to vector<16x512xbf16>
    %c0_11 = arith.constant 0 : index
    %c0_12 = arith.constant 0 : index
    %24 = vector.load %arg4[%c0_11, %c0_12] : memref<512x512xbf16, #tpu.memory_space<vmem>>, vector<512x512xbf16>
    %cst_13 = arith.constant dense<0.000000e+00> : vector<16x512xf32>
    %25 = tpu.matmul %23, %24, %cst_13 {dimension_numbers = #tpu.dot_dimension_numbers<[1], [0], [0], [1], [0, 0, 1, 1], [], []>} : vector<16x512xbf16>, vector<512x512xbf16>, vector<16x512xf32> -> vector<16x512xf32>
    %26 = vector.broadcast %4 : vector<1x512xf32> to vector<16x512xf32>
    %27 = arith.addf %25, %26 : vector<16x512xf32>
    %cst_14 = arith.constant 1.000000e-01 : f32
    %28 = vector.broadcast %cst_14 : f32 to vector<16x512xf32>
    %29 = arith.mulf %28, %27 : vector<16x512xf32>
    %30 = arith.maximumf %27, %29 : vector<16x512xf32>
    %31 = vector.shape_cast %30 : vector<16x512xf32> to vector<2x8x512xf32>
    %32 = vector.broadcast %6 : vector<1x1x512xf32> to vector<2x8x512xf32>
    %33 = arith.mulf %31, %32 : vector<2x8x512xf32>
    %cst_15 = arith.constant dense<0.000000e+00> : vector<2x8xf32>
    %34 = vector.multi_reduction <add>, %33, %cst_15 [2] : vector<2x8x512xf32> to vector<2x8xf32>
    "tpu.trace_start"() <{level = 10 : i32, message = "bnd,bmd->bnm"}> : () -> ()
    %cst_16 = arith.constant dense<0.000000e+00> : vector<2x8x8xf32>
    %35 = tpu.matmul %0, %0, %cst_16 {dimension_numbers = #tpu.dot_dimension_numbers<[2], [2], [1], [1], [0, 0, 0, 1, 1, 1], [0], [0]>} : vector<2x8x512xf32>, vector<2x8x512xf32>, vector<2x8x8xf32> -> vector<2x8x8xf32>
    "tpu.trace_stop"() : () -> ()
    %36 = arith.mulf %0, %0 : vector<2x8x512xf32>
    %cst_17 = arith.constant dense<0.000000e+00> : vector<2x8xf32>
    %37 = vector.multi_reduction <add>, %36, %cst_17 [2] : vector<2x8x512xf32> to vector<2x8xf32>
    %38 = vector.shape_cast %37 : vector<2x8xf32> to vector<2x8x1xf32>
    %39 = vector.shape_cast %37 : vector<2x8xf32> to vector<2x1x8xf32>
    %40 = vector.broadcast %38 : vector<2x8x1xf32> to vector<2x8x8xf32>
    %41 = vector.broadcast %39 : vector<2x1x8xf32> to vector<2x8x8xf32>
    %42 = arith.addf %40, %41 : vector<2x8x8xf32>
    %cst_18 = arith.constant 2.000000e+00 : f32
    %43 = vector.broadcast %cst_18 : f32 to vector<2x8x8xf32>
    %44 = arith.mulf %43, %35 : vector<2x8x8xf32>
    %45 = arith.subf %42, %44 : vector<2x8x8xf32>
    %cst_19 = arith.constant 0.000000e+00 : f32
    %46 = vector.broadcast %cst_19 : f32 to vector<2x8x8xf32>
    %47 = arith.maximumf %45, %46 : vector<2x8x8xf32>
    %cst_20 = arith.constant 0.000000e+00 : f32
    %48 = vector.broadcast %cst_20 : f32 to vector<2x8x8xf32>
    %49 = arith.subf %48, %47 : vector<2x8x8xf32>
    %50 = math.exp %49 : vector<2x8x8xf32>
    %51 = tpu.iota {dimensions = array<i32: 0>} : vector<8x8xi32>
    %52 = tpu.iota {dimensions = array<i32: 1>} : vector<8x8xi32>
    %53 = arith.cmpi eq, %51, %52 : vector<8x8xi32>
    %54 = vector.shape_cast %53 : vector<8x8xi1> to vector<1x8x8xi1>
    %cst_21 = arith.constant -9.900000e+01 : f32
    %55 = vector.broadcast %cst_21 : f32 to vector<2x8x8xf32>
    %56 = arith.mulf %55, %50 : vector<2x8x8xf32>
    %57 = vector.shape_cast %54 : vector<1x8x8xi1> to vector<1x8x8xi1>
    %58 = vector.broadcast %57 : vector<1x8x8xi1> to vector<2x8x8xi1>
    %59 = arith.select %58, %56, %50 : vector<2x8x8xi1>, vector<2x8x8xf32>
    %cst_22 = arith.constant dense<0xFF800000> : vector<2x8xf32>
    %60 = vector.multi_reduction <maximumf>, %59, %cst_22 [1] : vector<2x8x8xf32> to vector<2x8xf32>
    %61 = vector.shape_cast %60 : vector<2x8xf32> to vector<2x1x8xf32>
    %62 = vector.broadcast %61 : vector<2x1x8xf32> to vector<2x8x8xf32>
    %63 = arith.subf %59, %62 : vector<2x8x8xf32>
    %64 = math.exp %63 : vector<2x8x8xf32>
    %cst_23 = arith.constant dense<0.000000e+00> : vector<2x8xf32>
    %65 = vector.multi_reduction <add>, %64, %cst_23 [1] : vector<2x8x8xf32> to vector<2x8xf32>
    %66 = vector.shape_cast %65 : vector<2x8xf32> to vector<2x1x8xf32>
    %67 = vector.broadcast %66 : vector<2x1x8xf32> to vector<2x8x8xf32>
    %68 = arith.divf %64, %67 : vector<2x8x8xf32>
    %69 = vector.shape_cast %34 : vector<2x8xf32> to vector<2x8x1xf32>
    %70 = vector.broadcast %69 : vector<2x8x1xf32> to vector<2x8x8xf32>
    %71 = arith.mulf %68, %70 : vector<2x8x8xf32>
    %cst_24 = arith.constant dense<0.000000e+00> : vector<2x8xf32>
    %72 = vector.multi_reduction <add>, %71, %cst_24 [1] : vector<2x8x8xf32> to vector<2x8xf32>
    %cst_25 = arith.constant 1.000000e-01 : f32
    %73 = vector.broadcast %cst_25 : f32 to vector<2x8xf32>
    %74 = arith.mulf %73, %72 : vector<2x8xf32>
    %cst_26 = arith.constant 0.899999976 : f32
    %75 = vector.broadcast %cst_26 : f32 to vector<2x8xf32>
    %76 = arith.mulf %75, %13 : vector<2x8xf32>
    %77 = arith.addf %74, %76 : vector<2x8xf32>
    %78 = vector.broadcast %7 : vector<1x1xf32> to vector<2x8xf32>
    %79 = arith.addf %77, %78 : vector<2x8xf32>
    %80 = arith.negf %79 : vector<2x8xf32>
    %81 = math.exp %80 : vector<2x8xf32>
    %cst_27 = arith.constant 1.000000e+00 : f32
    %82 = vector.broadcast %cst_27 : f32 to vector<2x8xf32>
    %83 = arith.addf %82, %81 : vector<2x8xf32>
    %84 = arith.divf %82, %83 : vector<2x8xf32>
    %c0_28 = arith.constant 0 : index
    %c0_29 = arith.constant 0 : index
    %85 = vector.load %arg6[%c0_28, %c0_29] : memref<2x8xf32, #tpu.memory_space<vmem>>, vector<2x8xf32>
    tpu.vector_store %arg6[%c0_28, %c0_29], %84 {strides = array<i32>} : memref<2x8xf32, #tpu.memory_space<vmem>>, vector<2x8xf32>,
    return
  }
  func.func @transform_0(%arg0: i32) -> (i32, i32, i32) {
    %c0_i32 = arith.constant 0 : i32
    %c0_i32_0 = arith.constant 0 : i32
    %c0_i32_1 = arith.constant 0 : i32
    return %arg0, %c0_i32, %c0_i32_0 : i32, i32, i32
  }
  func.func @transform_1(%arg0: i32) -> (i32, i32, i32) {
    %c0_i32 = arith.constant 0 : i32
    %c0_i32_0 = arith.constant 0 : i32
    %c0_i32_1 = arith.constant 0 : i32
    return %arg0, %c0_i32, %c0_i32_0 : i32, i32, i32
  }
  func.func @transform_2(%arg0: i32) -> (i32, i32) {
    %c0_i32 = arith.constant 0 : i32
    %c0_i32_0 = arith.constant 0 : i32
    %c0_i32_1 = arith.constant 0 : i32
    return %c0_i32, %c0_i32_0 : i32, i32
  }
  func.func @transform_3(%arg0: i32) -> (i32, i32) {
    %c0_i32 = arith.constant 0 : i32
    %c0_i32_0 = arith.constant 0 : i32
    %c0_i32_1 = arith.constant 0 : i32
    return %c0_i32, %c0_i32_0 : i32, i32
  }
  func.func @transform_4(%arg0: i32) -> (i32, i32) {
    %c0_i32 = arith.constant 0 : i32
    %c0_i32_0 = arith.constant 0 : i32
    %c0_i32_1 = arith.constant 0 : i32
    return %c0_i32, %c0_i32_0 : i32, i32
  }
  func.func @transform_5(%arg0: i32) -> (i32, i32) {
    %c0_i32 = arith.constant 0 : i32
    %c0_i32_0 = arith.constant 0 : i32
    return %arg0, %c0_i32 : i32, i32
  }
}

</mosaic_0001>

<bundles_post_ra>
// kernel: neg.1
= control target key start
LH: loop header
LB: loop body
LE: loop exit
PB: predicated region body
PF: predicated region fallthrough
CT: control target
= control target key end

     0   :  { %s24_s0 = inlined_call_operand.vmem [shape: f32[2,8], index: 0, kind: input, shape index: {}]   ;;  %s25_s1 = inlined_call_operand.vmem [shape: f32[2,8], index: 1, kind: output, shape index: {}]  }
   0x1   :  { %v2_v0 = vld [vmem:[%s24_s0] sm:$0x3] }
   0x2   :  { %v5_v1 = vxor.u32 2147483648, %v2_v0 }
   0x4   :  { %7 = vst [vmem:[%s25_s1] sm:$0x3] %v5_v1 }

// kernel: sggnn_forward.1
= control target key start
LH: loop header
LB: loop body
LE: loop exit
PB: predicated region body
PF: predicated region fallthrough
CT: control target
= control target key end

     0   :  { %10 = vsyncpa [#allocation3], 0  ;;  %s3718_s0 = inlined_call_operand.vmem [shape: f32[2,1,512], index: 0, kind: input, shape index: {}]   ;;  %s3719_s1 = inlined_call_operand.hbm [shape: f32[2,8,512], index: 1, kind: input, shape index: {}]   ;;  %s3720_s2 = inlined_call_operand.hbm [shape: bf16[512,512], index: 2, kind: input, shape index: {}]   ;;  %s3721_s3 = inlined_call_operand.hbm [shape: bf16[512,512], index: 3, kind: input, shape index: {}]   ;;  %s3722_s4 = inlined_call_operand.vmem [shape: f32[4,512], index: 4, kind: input, shape index: {}]   ;;  %s3723_s5 = inlined_call_operand.vmem [shape: f32[2,8], index: 5, kind: output, shape index: {}]  }
   0x1   :  { %11 = vsyncpa [#allocation5], 0  ;;  %s3441_s18 = smov [#allocation4]   ;;  %s3371_s22 = scalar_lea.hbm %s3720_s2, 16384 }
   0x2   :  { %s31_s19 = sshll.u32 %s3441_s18, 4  ;;  %p3372_p0 = scmp.ne.s32.totalorder %s3720_s2, %s3371_s22  ;;  %s32_s19 = int_to_ptr.vmem [resolvable:$true] %s31_s19 }
   0x3   :  { %p3375_p1 = scmp.lt.u32.totalorder %s3371_s22, %s3720_s2 }
   0x5   :  { %p3377_p2 = pnand %p3375_p1, %p3372_p0 }
   0x7   :  { %3380 = shalt.err (!%p3377_p2)
}
   0x8   :  { %s3381_s27 = scalar_lea.vmem %s32_s19, 16384  ;;  %p3386_p4 = scmp.lt.s32.totalorder %s32_s19, %s32_s19 }
   0x9   :  { %p3382_p3 = scmp.ne.s32.totalorder %s32_s19, %s3381_s27  ;;  %p3387_p5 = scmp.lt.s32.totalorder %s3381_s27, %s3381_s27 }
   0xb   :  { %p3388_p6 = por %p3387_p5, %p3386_p4 }
   0xd   :  { %p3389_p7 = pnand %p3388_p6, %p3382_p3 }
   0xf   :  { %3392 = shalt.err (!%p3389_p7)
}
  0x10   :  { %s3442_s28 = smov 256   ;;  %s3443_s29 = smov 16  }
  0x11   :  { %37 = dma.hbm_to_vmem [thread:$0]  %s3720_s2, 16384, %s32_s19, [#allocation5], %s3442_s28, %s3442_s28, %s3443_s29  }
  0x12   :  { %s3444_s7 = smov [#allocation2]   ;;  %s3393_s11 = scalar_lea.hbm %s3719_s1, 1024 }
  0x13   :  { %s19_s8 = sshll.u32 %s3444_s7, 4  ;;  %p3394_p8 = scmp.ne.s32.totalorder %s3719_s1, %s3393_s11  ;;  %s20_s8 = int_to_ptr.vmem [resolvable:$true] %s19_s8 }
  0x14   :  { %p3397_p9 = scmp.lt.u32.totalorder %s3393_s11, %s3719_s1 }
  0x16   :  { %p3399_p10 = pnand %p3397_p9, %p3394_p8 }
  0x18   :  { %3402 = shalt.err (!%p3399_p10)
}
  0x19   :  { %s3403_s16 = scalar_lea.vmem %s20_s8, 1024  ;;  %p3408_p12 = scmp.lt.s32.totalorder %s20_s8, %s20_s8 }
  0x1a   :  { %p3404_p11 = scmp.ne.s32.totalorder %s20_s8, %s3403_s16  ;;  %p3409_p13 = scmp.lt.s32.totalorder %s3403_s16, %s3403_s16 }
  0x1c   :  { %p3410_p0 = por %p3409_p13, %p3408_p12 }
  0x1e   :  { %p3411_p1 = pnand %p3410_p0, %p3404_p11 }
  0x20   :  { %3414 = shalt.err (!%p3411_p1)
}
  0x21   :  { %s3445_s2 = smov 512   ;;  %s3446_s17 = smov 32  }
  0x22   :  { %25 = dma.hbm_to_vmem [thread:$0]  %s3719_s1, 1024, %s20_s8, [#allocation3], %s3445_s2, %s3445_s2, %s3446_s17  }
  0x23   :  { %s3447_s20 = smov [#allocation6]   ;;  %s3415_s24 = scalar_lea.hbm %s3721_s3, 16384 }
  0x24   :  { %s43_s21 = sshll.u32 %s3447_s20, 4  ;;  %p3416_p2 = scmp.ne.s32.totalorder %s3721_s3, %s3415_s24  ;;  %s44_s21 = int_to_ptr.vmem [resolvable:$true] %s43_s21 }
  0x25   :  { %p3419_p3 = scmp.lt.u32.totalorder %s3415_s24, %s3721_s3 }
  0x27   :  { %p3421_p4 = pnand %p3419_p3, %p3416_p2 }
  0x29   :  { %3424 = shalt.err (!%p3421_p4)
}
  0x2a   :  { %s3425_s6 = scalar_lea.vmem %s44_s21, 16384  ;;  %p3430_p6 = scmp.lt.s32.totalorder %s44_s21, %s44_s21 }
  0x2b   :  { %p3426_p5 = scmp.ne.s32.totalorder %s44_s21, %s3425_s6  ;;  %p3431_p7 = scmp.lt.s32.totalorder %s3425_s6, %s3425_s6 }
  0x2d   :  { %p3432_p8 = por %p3431_p7, %p3430_p6 }
  0x2f   :  { %p3433_p9 = pnand %p3432_p8, %p3426_p5 }
  0x31   :  { %3436 = shalt.err (!%p3433_p9)
}
  0x32   :  { %49 = dma.hbm_to_vmem [thread:$0]  %s3721_s3, 16384, %s44_s21, [#allocation5], %s3442_s28, %s3442_s28, %s3443_s29  }
  0x33   :  { %3437 = dma.done.wait [#allocation3], 1024  }
  0x34   :  { %3438 = vsyncadd [#allocation3], 4294966272 }
  0x35   :  { %3439 = dma.done.wait [#allocation5], 32768  }
  0x36   :  { %3440 = vsyncadd [#allocation5], 4294934528  ;;  %v2961_v0 = vld [vmem:[#allocation4 + $0x4] ss:$16 sps:$4 sm:$0xff]   ;;  %v2963_v1 = vld [vmem:[#allocation4 + $0xc] ss:$16 sps:$4 sm:$0xff]   ;;  %v75_v37 = vlaneseq }
  0x37   :  { %995 = vmatprep.subr.bf16.mxu0 %v2961_v0  ;;  %v2965_v2 = vld [vmem:[#allocation4] ss:$16 sps:$4 sm:$0xff]   ;;  %v2966_v3 = vld [vmem:[#allocation4 + $0x8] ss:$16 sps:$4 sm:$0xff]   ;;  %1081 = vmatprep.subr.bf16.mxu1 %v2963_v1  ;;  %v2967_v4 = vld [vmem:[#allocation4 + $0x24] ss:$16 sps:$4 sm:$0xff]  }
  0x38   :  { %996 = vmatpush1.bf16.msra.mxu0 %v2965_v2  ;;  %1082 = vmatpush1.bf16.msra.mxu1 %v2966_v3  ;;  %v2969_v5 = vld [vmem:[#allocation4 + $0x2c] ss:$16 sps:$4 sm:$0xff]   ;;  %v2971_v6 = vld [vmem:[#allocation4 + $0x20] ss:$16 sps:$4 sm:$0xff]   ;;  %v2972_v7 = vld [vmem:[#allocation4 + $0x28] ss:$16 sps:$4 sm:$0xff]  }
  0x39   :  { %997 = vmatprep.subr.bf16.mxu0 %v2967_v4  ;;  %1083 = vmatprep.subr.bf16.mxu1 %v2969_v5  ;;  %v2973_v8 = vld [vmem:[#allocation4 + $0x44] ss:$16 sps:$4 sm:$0xff]   ;;  %v2975_v9 = vld [vmem:[#allocation4 + $0x4c] ss:$16 sps:$4 sm:$0xff]   ;;  %v2977_v10 = vld [vmem:[#allocation4 + $0x40] ss:$16 sps:$4 sm:$0xff]  }
  0x3a   :  { %v2978_v11 = vld [vmem:[#allocation4 + $0x48] ss:$16 sps:$4 sm:$0xff]   ;;  %v2979_v12 = vld [vmem:[#allocation4 + $0x64] ss:$16 sps:$4 sm:$0xff]   ;;  %v2981_v13 = vld [vmem:[#allocation4 + $0x6c] ss:$16 sps:$4 sm:$0xff]  }
  0x3b   :  { %v2983_v14 = vld [vmem:[#allocation4 + $0x60] ss:$16 sps:$4 sm:$0xff]   ;;  %v2984_v15 = vld [vmem:[#allocation4 + $0x68] ss:$16 sps:$4 sm:$0xff]   ;;  %v2985_v16 = vld [vmem:[#allocation4 + $0x84] ss:$16 sps:$4 sm:$0xff]  }
  0x3c   :  { %998 = vmatpush1.bf16.msra.mxu0 %v2971_v6  ;;  %1084 = vmatpush1.bf16.msra.mxu1 %v2972_v7  ;;  %v2987_v17 = vld [vmem:[#allocation4 + $0x8c] ss:$16 sps:$4 sm:$0xff]   ;;  %v2989_v18 = vld [vmem:[#allocation4 + $0x80] ss:$16 sps:$4 sm:$0xff]   ;;  %v2990_v19 = vld [vmem:[#allocation4 + $0x88] ss:$16 sps:$4 sm:$0xff]  }
  0x3d   :  { %999 = vmatprep.subr.bf16.mxu0 %v2973_v8  ;;  %1085 = vmatprep.subr.bf16.mxu1 %v2975_v9  ;;  %v2991_v20 = vld [vmem:[#allocation4 + $0xa4] ss:$16 sps:$4 sm:$0xff]   ;;  %v2993_v21 = vld [vmem:[#allocation4 + $0xac] ss:$16 sps:$4 sm:$0xff]   ;;  %v2995_v22 = vld [vmem:[#allocation4 + $0xa0] ss:$16 sps:$4 sm:$0xff]  }
  0x3e   :  { %v2996_v23 = vld [vmem:[#allocation4 + $0xa8] ss:$16 sps:$4 sm:$0xff]   ;;  %v2997_v24 = vld [vmem:[#allocation4 + $0xc4] ss:$16 sps:$4 sm:$0xff]   ;;  %v2999_v25 = vld [vmem:[#allocation4 + $0xcc] ss:$16 sps:$4 sm:$0xff]  }
  0x3f   :  { %v3001_v26 = vld [vmem:[#allocation4 + $0xc0] ss:$16 sps:$4 sm:$0xff]   ;;  %v3002_v27 = vld [vmem:[#allocation4 + $0xc8] ss:$16 sps:$4 sm:$0xff]   ;;  %v3003_v28 = vld [vmem:[#allocation4 + $0xe4] ss:$16 sps:$4 sm:$0xff]  }
  0x40   :  { %1000 = vmatpush1.bf16.msra.mxu0 %v2977_v10  ;;  %1086 = vmatpush1.bf16.msra.mxu1 %v2978_v11  ;;  %v3005_v29 = vld [vmem:[#allocation4 + $0xec] ss:$16 sps:$4 sm:$0xff]   ;;  %v3007_v30 = vld [vmem:[#allocation4 + $0xe0] ss:$16 sps:$4 sm:$0xff]   ;;  %v3008_v31 = vld [vmem:[#allocation4 + $0xe8] ss:$16 sps:$4 sm:$0xff]  }
  0x41   :  { %1001 = vmatprep.subr.bf16.mxu0 %v2979_v12  ;;  %1087 = vmatprep.subr.bf16.mxu1 %v2981_v13  ;;  %v3009_v32 = vld [vmem:[#allocation4 + $0x104] ss:$16 sps:$4 sm:$0xff]   ;;  %v3011_v33 = vld [vmem:[#allocation4 + $0x10c] ss:$16 sps:$4 sm:$0xff]   ;;  %v3013_v34 = vld [vmem:[#allocation4 + $0x100] ss:$16 sps:$4 sm:$0xff]  }
  0x42   :  { %v3014_v35 = vld [vmem:[#allocation4 + $0x108] ss:$16 sps:$4 sm:$0xff]   ;;  %v3015_v36 = vld [vmem:[#allocation4 + $0x124] ss:$16 sps:$4 sm:$0xff]   ;;  %v3017_v38 = vld [vmem:[#allocation4 + $0x12c] ss:$16 sps:$4 sm:$0xff]  }
  0x43   :  { %v3019_v39 = vld [vmem:[#allocation4 + $0x120] ss:$16 sps:$4 sm:$0xff]   ;;  %v3020_v40 = vld [vmem:[#allocation4 + $0x128] ss:$16 sps:$4 sm:$0xff]   ;;  %v3021_v41 = vld [vmem:[#allocation4 + $0x144] ss:$16 sps:$4 sm:$0xff]  }
  0x44   :  { %1002 = vmatpush1.bf16.msra.mxu0 %v2983_v14  ;;  %1088 = vmatpush1.bf16.msra.mxu1 %v2984_v15  ;;  %v3521_v42 = vshrl.u32 %v75_v37, 7  ;;  %v3023_v43 = vld [vmem:[#allocation4 + $0x14c] ss:$16 sps:$4 sm:$0xff]   ;;  %v3025_v44 = vld [vmem:[#allocation4 + $0x140] ss:$16 sps:$4 sm:$0xff]   ;;  %vm2551_vm1 = vcmask 64512  }
  0x45   :  { %1003 = vmatprep.subr.bf16.mxu0 %v2985_v16  ;;  %1089 = vmatprep.subr.bf16.mxu1 %v2987_v17  ;;  %v3026_v45 = vld [vmem:[#allocation4 + $0x148] ss:$16 sps:$4 sm:$0xff]   ;;  %v3027_v46 = vld [vmem:[#allocation4 + $0x164] ss:$16 sps:$4 sm:$0xff]   ;;  %v3029_v48 = vld [vmem:[#allocation4 + $0x16c] ss:$16 sps:$4 sm:$0xff]  }
  0x46   :  { %v3524_v47 = vsub.s32 1, %v3521_v42  ;;  %v3031_v49 = vld [vmem:[#allocation4 + $0x160] ss:$16 sps:$4 sm:$0xff]   ;;  %v62_v50 = vld [vmem:[#allocation2 + $0x8] sm:$0xff]  ;;  %v3534_v53 = vld [vmem:[%s3718_s0 + $0x4] sm:$0xf] }
  0x47   :  { %v66_v51 = vld [vmem:[#allocation2 + $0x28] sm:$0xff]  ;;  %v3529_v52 = vld [vmem:[%s3718_s0] sm:$0xf]  ;;  %v3033_v57 = vld [vmem:[#allocation4 + $0x184] ss:$16 sps:$4 sm:$0xff]   ;;  %v3541_v62 = vsub.s32 0, %v3521_v42 }
  0x48   :  { %1004 = vmatpush1.bf16.msra.mxu0 %v2989_v18  ;;  %1090 = vmatpush1.bf16.msra.mxu1 %v2990_v19  ;;  %v3032_v54 = vld [vmem:[#allocation4 + $0x168] ss:$16 sps:$4 sm:$0xff]   ;;  %v82_v55 = vrot.slane %v3529_v52, %v3524_v47  ;;  %v98_v56 = vrot.slane %v3534_v53, %v3524_v47  ;;  %v3035_v58 = vld [vmem:[#allocation4 + $0x18c] ss:$16 sps:$4 sm:$0xff]   ;;  %v3037_v61 = vld [vmem:[#allocation4 + $0x180] ss:$16 sps:$4 sm:$0xff]  }
  0x49   :  { %1005 = vmatprep.subr.bf16.mxu0 %v2991_v20  ;;  %1091 = vmatprep.subr.bf16.mxu1 %v2993_v21  ;;  %v3038_v63 = vld [vmem:[#allocation4 + $0x188] ss:$16 sps:$4 sm:$0xff]   ;;  %v3039_v0 = vld [vmem:[#allocation4 + $0x1a4] ss:$16 sps:$4 sm:$0xff]   ;;  %v3041_v3 = vld [vmem:[#allocation4 + $0x1ac] ss:$16 sps:$4 sm:$0xff]   ;;  %v78_v8 = vrot.slane %v3529_v52, %v3541_v62  ;;  %v94_v9 = vrot.slane %v3534_v53, %v3541_v62 }
  0x4a   :  { %v116_v59 = vsub.f32 %v82_v55, %v62_v50  ;;  %v120_v60 = vsub.f32 %v98_v56, %v66_v51  ;;  %v3043_v4 = vld [vmem:[#allocation4 + $0x1a0] ss:$16 sps:$4 sm:$0xff]   ;;  %v3044_v6 = vld [vmem:[#allocation4 + $0x1a8] ss:$16 sps:$4 sm:$0xff]   ;;  %v3045_v7 = vld [vmem:[#allocation4 + $0x1c4] ss:$16 sps:$4 sm:$0xff]  }
  0x4b   :  { %v3553_v10 = vld [vmem:[#allocation2] sm:$0xff]  ;;  %v3047_v12 = vld [vmem:[#allocation4 + $0x1cc] ss:$16 sps:$4 sm:$0xff]   ;;  %v3050_v16 = vld [vmem:[#allocation4 + $0x1c8] ss:$16 sps:$4 sm:$0xff]   ;;  %vm2507_vm2 = vcmask 1041409  }
  0x4c   :  { %1006 = vmatpush1.bf16.msra.mxu0 %v2995_v22  ;;  %1092 = vmatpush1.bf16.msra.mxu1 %v2996_v23  ;;  %v3543_v1 = vmul.f32 %v116_v59, %v116_v59  ;;  %v3545_v2 = vmul.f32 %v120_v60, %v120_v60  ;;  %v3555_v11 = vld [vmem:[#allocation2 + $0x20] sm:$0xff]  ;;  %v115_v14 = vsub.f32 %v78_v8, %v3553_v10  ;;  %v3053_v18 = vld [vmem:[#allocation4 + $0x1ec] ss:$16 sps:$4 sm:$0xff]   ;;  %v3056_v22 = vld [vmem:[#allocation4 + $0x1e8] ss:$16 sps:$4 sm:$0xff]   ;;  %vm2650_vm3 = vcmask 58368  }
  0x4d   :  { %1007 = vmatprep.subr.bf16.mxu0 %v2997_v24  ;;  %1093 = vmatprep.subr.bf16.mxu1 %v2999_v25  ;;  %v3049_v13 = vld [vmem:[#allocation4 + $0x1c0] ss:$16 sps:$4 sm:$0xff]   ;;  %v119_v15 = vsub.f32 %v94_v9, %v3555_v11  ;;  %v3051_v17 = vld [vmem:[#allocation4 + $0x1e4] ss:$16 sps:$4 sm:$0xff]   ;;  %v3062_v24 = vld [vmem:[#allocation4 + $0x20c] ss:$16 sps:$4 sm:$0xff]  }
  0x4e   :  { %v188_v5 = vpack.c.bf16 %v3545_v2, %v3543_v1  ;;  %v3055_v19 = vld [vmem:[#allocation4 + $0x1e0] ss:$16 sps:$4 sm:$0xff]   ;;  %v3559_v20 = vmul.f32 %v115_v14, %v115_v14  ;;  %v3059_v23 = vld [vmem:[#allocation4 + $0x204] ss:$16 sps:$4 sm:$0xff]   ;;  %v3090_v51 = vld [vmem:[#allocation4 + $0x2a8] ss:$16 sps:$4 sm:$0xff]  }
  0x4f   :  { %v3561_v21 = vmul.f32 %v119_v15, %v119_v15  ;;  %v3057_v25 = vld [vmem:[#allocation4 + $0x200] ss:$16 sps:$4 sm:$0xff]   ;;  %v3098_v56 = vld [vmem:[#allocation4 + $0x2cc] ss:$16 sps:$4 sm:$0xff]   ;;  %v3096_v60 = vld [vmem:[#allocation4 + $0x2c8] ss:$16 sps:$4 sm:$0xff]  }
  0x50   :  { %1008 = vmatpush1.bf16.msra.mxu0 %v3001_v26  ;;  %1094 = vmatpush1.bf16.msra.mxu1 %v3002_v27  ;;  %v3060_v27 = vld [vmem:[#allocation4 + $0x208] ss:$16 sps:$4 sm:$0xff]   ;;  %v3087_v50 = vld [vmem:[#allocation4 + $0x2a0] ss:$16 sps:$4 sm:$0xff]   ;;  %v3107_v9 = vld [vmem:[#allocation4 + $0x304] ss:$16 sps:$4 sm:$0xff]  }
  0x51   :  { %1009 = vmatprep.subr.bf16.mxu0 %v3003_v28  ;;  %1095 = vmatprep.subr.bf16.mxu1 %v3005_v29  ;;  %v187_v26 = vpack.c.bf16 %v3561_v21, %v3559_v20  ;;  %v3065_v28 = vld [vmem:[#allocation4 + $0x224] ss:$16 sps:$4 sm:$0xff]   ;;  %v3068_v29 = vld [vmem:[#allocation4 + $0x22c] ss:$16 sps:$4 sm:$0xff]   ;;  %v3102_v8 = vld [vmem:[#allocation4 + $0x2e8] ss:$16 sps:$4 sm:$0xff]  }
  0x52   :  { %1027 = vmatprep.mubr.bf16.mxu0 %v188_v5  ;;  %1113 = vmatprep.mubr.bf16.mxu1 %v188_v5  ;;  %v3572_v59 = vld [vmem:[#allocation2 + $0x18] sm:$0xff]  ;;  %v3105_v14 = vld [vmem:[#allocation4 + $0x300] ss:$16 sps:$4 sm:$0xff]  }
  0x53   :  { %v3108_v15 = vld [vmem:[#allocation4 + $0x308] ss:$16 sps:$4 sm:$0xff]  }
  0x54   :  { %1010 = vmatpush1.bf16.msra.mxu0 %v3007_v30  ;;  %1096 = vmatpush1.bf16.msra.mxu1 %v3008_v31  ;;  %v3063_v30 = vld [vmem:[#allocation4 + $0x220] ss:$16 sps:$4 sm:$0xff]   ;;  %v3066_v31 = vld [vmem:[#allocation4 + $0x228] ss:$16 sps:$4 sm:$0xff]  }
  0x55   :  { %1011 = vmatprep.subr.bf16.mxu0 %v3009_v32  ;;  %1097 = vmatprep.subr.bf16.mxu1 %v3011_v33  ;;  %v3071_v32 = vld [vmem:[#allocation4 + $0x244] ss:$16 sps:$4 sm:$0xff]   ;;  %v3074_v33 = vld [vmem:[#allocation4 + $0x24c] ss:$16 sps:$4 sm:$0xff]  }
  0x58   :  { %1012 = vmatpush1.bf16.msra.mxu0 %v3013_v34  ;;  %1098 = vmatpush1.bf16.msra.mxu1 %v3014_v35  ;;  %v3069_v34 = vld [vmem:[#allocation4 + $0x240] ss:$16 sps:$4 sm:$0xff]   ;;  %v3072_v35 = vld [vmem:[#allocation4 + $0x248] ss:$16 sps:$4 sm:$0xff]  }
  0x59   :  { %1013 = vmatprep.subr.bf16.mxu0 %v3015_v36  ;;  %1099 = vmatprep.subr.bf16.mxu1 %v3017_v38  ;;  %v3077_v36 = vld [vmem:[#allocation4 + $0x264] ss:$16 sps:$4 sm:$0xff]   ;;  %v3080_v38 = vld [vmem:[#allocation4 + $0x26c] ss:$16 sps:$4 sm:$0xff]  }
  0x5c   :  { %1014 = vmatpush1.bf16.msra.mxu0 %v3019_v39  ;;  %1100 = vmatpush1.bf16.msra.mxu1 %v3020_v40  ;;  %v3075_v39 = vld [vmem:[#allocation4 + $0x260] ss:$16 sps:$4 sm:$0xff]   ;;  %v3078_v40 = vld [vmem:[#allocation4 + $0x268] ss:$16 sps:$4 sm:$0xff]  }
  0x5d   :  { %1015 = vmatprep.subr.bf16.mxu0 %v3021_v41  ;;  %1101 = vmatprep.subr.bf16.mxu1 %v3023_v43  ;;  %v3083_v41 = vld [vmem:[#allocation4 + $0x284] ss:$16 sps:$4 sm:$0xff]   ;;  %v3086_v43 = vld [vmem:[#allocation4 + $0x28c] ss:$16 sps:$4 sm:$0xff]  }
  0x60   :  { %1016 = vmatpush1.bf16.msra.mxu0 %v3025_v44  ;;  %1102 = vmatpush1.bf16.msra.mxu1 %v3026_v45  ;;  %v3081_v44 = vld [vmem:[#allocation4 + $0x280] ss:$16 sps:$4 sm:$0xff]   ;;  %v3084_v45 = vld [vmem:[#allocation4 + $0x288] ss:$16 sps:$4 sm:$0xff]  }
  0x61   :  { %1017 = vmatprep.subr.bf16.mxu0 %v3027_v46  ;;  %1103 = vmatprep.subr.bf16.mxu1 %v3029_v48  ;;  %v3089_v46 = vld [vmem:[#allocation4 + $0x2a4] ss:$16 sps:$4 sm:$0xff]   ;;  %v3566_v48 = vsub.s32 3, %v3521_v42 }
  0x63   :  { %v90_v55 = vrot.slane %v3529_v52, %v3566_v48 }
  0x64   :  { %1018 = vmatpush1.bf16.msra.mxu0 %v3031_v49  ;;  %1104 = vmatpush1.bf16.msra.mxu1 %v3032_v54  ;;  %v3092_v49 = vld [vmem:[#allocation4 + $0x2ac] ss:$16 sps:$4 sm:$0xff]   ;;  %v3095_v54 = vld [vmem:[#allocation4 + $0x2c4] ss:$16 sps:$4 sm:$0xff]  }
  0x65   :  { %1019 = vmatprep.subr.bf16.mxu0 %v3033_v57  ;;  %1105 = vmatprep.subr.bf16.mxu1 %v3035_v58  ;;  %v106_v57 = vrot.slane %v3534_v53, %v3566_v48  ;;  %v3093_v58 = vld [vmem:[#allocation4 + $0x2c0] ss:$16 sps:$4 sm:$0xff]  }
  0x68   :  { %1020 = vmatpush1.bf16.msra.mxu0 %v3037_v61  ;;  %1106 = vmatpush1.bf16.msra.mxu1 %v3038_v63  ;;  %v3101_v61 = vld [vmem:[#allocation4 + $0x2e4] ss:$16 sps:$4 sm:$0xff]   ;;  %v3574_v63 = vld [vmem:[#allocation2 + $0x38] sm:$0xff] }
  0x69   :  { %1021 = vmatprep.subr.bf16.mxu0 %v3039_v0  ;;  %1107 = vmatprep.subr.bf16.mxu1 %v3041_v3  ;;  %v118_v0 = vsub.f32 %v90_v55, %v3572_v59  ;;  %v3104_v3 = vld [vmem:[#allocation4 + $0x2ec] ss:$16 sps:$4 sm:$0xff]   ;;  %v3147_v55 = vld [vmem:[#allocation4 + $0x3e0] ss:$16 sps:$4 sm:$0xff]  }
  0x6b   :  { %v3578_v5 = vmul.f32 %v118_v0, %v118_v0  ;;  %v3153_v0 = vld [vmem:[#allocation6] ss:$16 sps:$4 sm:$0xff]  }
  0x6c   :  { %1022 = vmatpush1.bf16.msra.mxu0 %v3043_v4  ;;  %1108 = vmatpush1.bf16.msra.mxu1 %v3044_v6  ;;  %v122_v4 = vsub.f32 %v106_v57, %v3574_v63  ;;  %v3099_v6 = vld [vmem:[#allocation4 + $0x2e0] ss:$16 sps:$4 sm:$0xff]  }
  0x6d   :  { %1023 = vmatprep.subr.bf16.mxu0 %v3045_v7  ;;  %1109 = vmatprep.subr.bf16.mxu1 %v3047_v12  ;;  %v3110_v12 = vld [vmem:[#allocation4 + $0x30c] ss:$16 sps:$4 sm:$0xff]  }
  0x6e   :  { %v3580_v7 = vmul.f32 %v122_v4, %v122_v4 }
  0x70   :  { %1024 = vmatpush1.bf16.msra.mxu0 %v3049_v13  ;;  %1110 = vmatpush1.bf16.msra.mxu1 %v3050_v16  ;;  %v190_v13 = vpack.c.bf16 %v3580_v7, %v3578_v5  ;;  %v3113_v16 = vld [vmem:[#allocation4 + $0x324] ss:$16 sps:$4 sm:$0xff]  }
  0x71   :  { %1025 = vmatprep.subr.bf16.mxu0 %v3051_v17  ;;  %1111 = vmatprep.subr.bf16.mxu1 %v3053_v18  ;;  %v3116_v17 = vld [vmem:[#allocation4 + $0x32c] ss:$16 sps:$4 sm:$0xff]   ;;  %v3111_v18 = vld [vmem:[#allocation4 + $0x320] ss:$16 sps:$4 sm:$0xff]  }
  0x74   :  { %1026 = vmatpush1.bf16.msra.mxu0 %v3055_v19  ;;  %1112 = vmatpush1.bf16.msra.mxu1 %v3056_v22  ;;  %v3114_v19 = vld [vmem:[#allocation4 + $0x328] ss:$16 sps:$4 sm:$0xff]   ;;  %v3119_v22 = vld [vmem:[#allocation4 + $0x344] ss:$16 sps:$4 sm:$0xff]  }
  0x75   :  { %1038 = vmatprep.subr.bf16.mxu0 %v3059_v23  ;;  %1124 = vmatprep.subr.bf16.mxu1 %v3062_v24  ;;  %v3122_v23 = vld [vmem:[#allocation4 + $0x34c] ss:$16 sps:$4 sm:$0xff]   ;;  %v3117_v24 = vld [vmem:[#allocation4 + $0x340] ss:$16 sps:$4 sm:$0xff]  }
  0x77   :  { %1028 = vmatmul.mubr.bf16.vlgmr.msra.gmra.mrb[0].mxu0 %v187_v26  ;;  %1114 = vmatmul.mubr.bf16.vlgmr.msra.gmra.mrb[0].mxu1 %v187_v26  ;;  %v3125_v26 = vld [vmem:[#allocation4 + $0x364] ss:$16 sps:$4 sm:$0xff]  }
  0x78   :  { %1039 = vmatpush1.bf16.msra.mxu0 %v3057_v25  ;;  %1125 = vmatpush1.bf16.msra.mxu1 %v3060_v27  ;;  %v3120_v25 = vld [vmem:[#allocation4 + $0x348] ss:$16 sps:$4 sm:$0xff]   ;;  %v3128_v27 = vld [vmem:[#allocation4 + $0x36c] ss:$16 sps:$4 sm:$0xff]  }
  0x79   :  { %1040 = vmatprep.subr.bf16.mxu0 %v3065_v28  ;;  %1126 = vmatprep.subr.bf16.mxu1 %v3068_v29  ;;  %v3123_v28 = vld [vmem:[#allocation4 + $0x360] ss:$16 sps:$4 sm:$0xff]   ;;  %v3126_v29 = vld [vmem:[#allocation4 + $0x368] ss:$16 sps:$4 sm:$0xff]  }
  0x7a   :  { %1070 = vmatprep.mubr.bf16.mxu0 %v190_v13  ;;  %1156 = vmatprep.mubr.bf16.mxu1 %v190_v13  ;;  %v3167_v13 = vld [vmem:[#allocation6 + $0x44] ss:$16 sps:$4 sm:$0xff]  }
  0x7c   :  { %1041 = vmatpush1.bf16.msra.mxu0 %v3063_v30  ;;  %1127 = vmatpush1.bf16.msra.mxu1 %v3066_v31  ;;  %v3131_v30 = vld [vmem:[#allocation4 + $0x384] ss:$16 sps:$4 sm:$0xff]   ;;  %v3134_v31 = vld [vmem:[#allocation4 + $0x38c] ss:$16 sps:$4 sm:$0xff]  }
  0x7d   :  { %1042 = vmatprep.subr.bf16.mxu0 %v3071_v32  ;;  %1128 = vmatprep.subr.bf16.mxu1 %v3074_v33  ;;  %v3585_v32 = vsub.s32 2, %v3521_v42  ;;  %v3129_v33 = vld [vmem:[#allocation4 + $0x380] ss:$16 sps:$4 sm:$0xff]  }
  0x80   :  { %1043 = vmatpush1.bf16.msra.mxu0 %v3069_v34  ;;  %1129 = vmatpush1.bf16.msra.mxu1 %v3072_v35  ;;  %v3132_v34 = vld [vmem:[#allocation4 + $0x388] ss:$16 sps:$4 sm:$0xff]   ;;  %v3137_v35 = vld [vmem:[#allocation4 + $0x3a4] ss:$16 sps:$4 sm:$0xff]  }
  0x81   :  { %1044 = vmatprep.subr.bf16.mxu0 %v3077_v36  ;;  %1130 = vmatprep.subr.bf16.mxu1 %v3080_v38  ;;  %v3140_v36 = vld [vmem:[#allocation4 + $0x3ac] ss:$16 sps:$4 sm:$0xff]   ;;  %v3135_v38 = vld [vmem:[#allocation4 + $0x3a0] ss:$16 sps:$4 sm:$0xff]  }
  0x84   :  { %1045 = vmatpush1.bf16.msra.mxu0 %v3075_v39  ;;  %1131 = vmatpush1.bf16.msra.mxu1 %v3078_v40  ;;  %v3138_v39 = vld [vmem:[#allocation4 + $0x3a8] ss:$16 sps:$4 sm:$0xff]   ;;  %v3143_v40 = vld [vmem:[#allocation4 + $0x3c4] ss:$16 sps:$4 sm:$0xff]  }
  0x85   :  { %1046 = vmatprep.subr.bf16.mxu0 %v3083_v41  ;;  %1132 = vmatprep.subr.bf16.mxu1 %v3086_v43  ;;  %v86_v41 = vrot.slane %v3529_v52, %v3585_v32  ;;  %v102_v43 = vrot.slane %v3534_v53, %v3585_v32  ;;  %v3144_v52 = vld [vmem:[#allocation4 + $0x3c8] ss:$16 sps:$4 sm:$0xff]   ;;  %v3152_v53 = vld [vmem:[#allocation4 + $0x3ec] ss:$16 sps:$4 sm:$0xff]  }
  0x88   :  { %1047 = vmatpush1.bf16.msra.mxu0 %v3081_v44  ;;  %1133 = vmatpush1.bf16.msra.mxu1 %v3084_v45  ;;  %v3591_v44 = vld [vmem:[#allocation2 + $0x10] sm:$0xff] }
  0x89   :  { %1048 = vmatprep.subr.bf16.mxu0 %v3089_v46  ;;  %1134 = vmatprep.subr.bf16.mxu1 %v3092_v49  ;;  %v3593_v45 = vld [vmem:[#allocation2 + $0x30] sm:$0xff]  ;;  %v3146_v46 = vld [vmem:[#allocation4 + $0x3cc] ss:$16 sps:$4 sm:$0xff]  }
  0x8a   :  { %v3141_v49 = vld [vmem:[#allocation4 + $0x3c0] ss:$16 sps:$4 sm:$0xff]  }
  0x8c   :  { %1049 = vmatpush1.bf16.msra.mxu0 %v3087_v50  ;;  %1135 = vmatpush1.bf16.msra.mxu1 %v3090_v51  ;;  %v117_v50 = vsub.f32 %v86_v41, %v3591_v44  ;;  %v121_v51 = vsub.f32 %v102_v43, %v3593_v45  ;;  %v3203_v41 = vld [vmem:[#allocation6 + $0x104] ss:$16 sps:$4 sm:$0xff]   ;;  %v3206_v43 = vld [vmem:[#allocation6 + $0x10c] ss:$16 sps:$4 sm:$0xff]  }
  0x8d   :  { %1050 = vmatprep.subr.bf16.mxu0 %v3095_v54  ;;  %1136 = vmatprep.subr.bf16.mxu1 %v3098_v56  ;;  %v3149_v54 = vld [vmem:[#allocation4 + $0x3e4] ss:$16 sps:$4 sm:$0xff]   ;;  %v3150_v56 = vld [vmem:[#allocation4 + $0x3e8] ss:$16 sps:$4 sm:$0xff]  }
  0x8e   :  { %v3597_v57 = vmul.f32 %v117_v50, %v117_v50  ;;  %v3209_v50 = vld [vmem:[#allocation6 + $0x124] ss:$16 sps:$4 sm:$0xff]  }
  0x90   :  { %1051 = vmatpush1.bf16.msra.mxu0 %v3093_v58  ;;  %1137 = vmatpush1.bf16.msra.mxu1 %v3096_v60  ;;  %v3599_v58 = vmul.f32 %v121_v51, %v121_v51  ;;  %v3155_v60 = vld [vmem:[#allocation6 + $0x4] ss:$16 sps:$4 sm:$0xff]   ;;  %v3212_v51 = vld [vmem:[#allocation6 + $0x12c] ss:$16 sps:$4 sm:$0xff]  }
  0x91   :  { %1052 = vmatprep.subr.bf16.mxu0 %v3101_v61  ;;  %1138 = vmatprep.subr.bf16.mxu1 %v3104_v3  ;;  %v3158_v61 = vld [vmem:[#allocation6 + $0xc] ss:$16 sps:$4 sm:$0xff]   ;;  %v3156_v3 = vld [vmem:[#allocation6 + $0x8] ss:$16 sps:$4 sm:$0xff]  }
  0x92   :  { %v189_v4 = vpack.c.bf16 %v3599_v58, %v3597_v57 }
  0x94   :  { %1053 = vmatpush1.bf16.msra.mxu0 %v3099_v6  ;;  %1139 = vmatpush1.bf16.msra.mxu1 %v3102_v8  ;;  %v3161_v6 = vld [vmem:[#allocation6 + $0x24] ss:$16 sps:$4 sm:$0xff]   ;;  %v3164_v8 = vld [vmem:[#allocation6 + $0x2c] ss:$16 sps:$4 sm:$0xff]  }
  0x95   :  { %1054 = vmatprep.subr.bf16.mxu0 %v3107_v9  ;;  %1140 = vmatprep.subr.bf16.mxu1 %v3110_v12  ;;  %v3159_v9 = vld [vmem:[#allocation6 + $0x20] ss:$16 sps:$4 sm:$0xff]   ;;  %v3162_v12 = vld [vmem:[#allocation6 + $0x28] ss:$16 sps:$4 sm:$0xff]  }
  0x98   :  { %1055 = vmatpush1.bf16.msra.mxu0 %v3105_v14  ;;  %1141 = vmatpush1.bf16.msra.mxu1 %v3108_v15  ;;  %v3170_v14 = vld [vmem:[#allocation6 + $0x4c] ss:$16 sps:$4 sm:$0xff]   ;;  %v3165_v15 = vld [vmem:[#allocation6 + $0x40] ss:$16 sps:$4 sm:$0xff]  }
  0x99   :  { %1056 = vmatprep.subr.bf16.mxu0 %v3113_v16  ;;  %1142 = vmatprep.subr.bf16.mxu1 %v3116_v17  ;;  %v3168_v16 = vld [vmem:[#allocation6 + $0x48] ss:$16 sps:$4 sm:$0xff]   ;;  %v3173_v17 = vld [vmem:[#allocation6 + $0x64] ss:$16 sps:$4 sm:$0xff]  }
  0x9c   :  { %1057 = vmatpush1.bf16.msra.mxu0 %v3111_v18  ;;  %1143 = vmatpush1.bf16.msra.mxu1 %v3114_v19  ;;  %v3176_v18 = vld [vmem:[#allocation6 + $0x6c] ss:$16 sps:$4 sm:$0xff]   ;;  %v3171_v19 = vld [vmem:[#allocation6 + $0x60] ss:$16 sps:$4 sm:$0xff]  }
  0x9d   :  { %1058 = vmatprep.subr.bf16.mxu0 %v3119_v22  ;;  %1144 = vmatprep.subr.bf16.mxu1 %v3122_v23  ;;  %v3174_v22 = vld [vmem:[#allocation6 + $0x68] ss:$16 sps:$4 sm:$0xff]   ;;  %v3179_v23 = vld [vmem:[#allocation6 + $0x84] ss:$16 sps:$4 sm:$0xff]  }
  0xa0   :  { %1059 = vmatpush1.bf16.msra.mxu0 %v3117_v24  ;;  %1145 = vmatpush1.bf16.msra.mxu1 %v3120_v25  ;;  %v3182_v24 = vld [vmem:[#allocation6 + $0x8c] ss:$16 sps:$4 sm:$0xff]   ;;  %v3177_v25 = vld [vmem:[#allocation6 + $0x80] ss:$16 sps:$4 sm:$0xff]  }
  0xa1   :  { %1060 = vmatprep.subr.bf16.mxu0 %v3125_v26  ;;  %1146 = vmatprep.subr.bf16.mxu1 %v3128_v27  ;;  %v3180_v26 = vld [vmem:[#allocation6 + $0x88] ss:$16 sps:$4 sm:$0xff]   ;;  %v3185_v27 = vld [vmem:[#allocation6 + $0xa4] ss:$16 sps:$4 sm:$0xff]  }
  0xa4   :  { %1061 = vmatpush1.bf16.msra.mxu0 %v3123_v28  ;;  %1147 = vmatpush1.bf16.msra.mxu1 %v3126_v29  ;;  %v3188_v28 = vld [vmem:[#allocation6 + $0xac] ss:$16 sps:$4 sm:$0xff]   ;;  %v3183_v29 = vld [vmem:[#allocation6 + $0xa0] ss:$16 sps:$4 sm:$0xff]  }
  0xa5   :  { %1062 = vmatprep.subr.bf16.mxu0 %v3131_v30  ;;  %1148 = vmatprep.subr.bf16.mxu1 %v3134_v31  ;;  %v3186_v30 = vld [vmem:[#allocation6 + $0xa8] ss:$16 sps:$4 sm:$0xff]   ;;  %v3191_v31 = vld [vmem:[#allocation6 + $0xc4] ss:$16 sps:$4 sm:$0xff]  }
  0xa8   :  { %1063 = vmatpush1.bf16.msra.mxu0 %v3129_v33  ;;  %1149 = vmatpush1.bf16.msra.mxu1 %v3132_v34  ;;  %v3194_v33 = vld [vmem:[#allocation6 + $0xcc] ss:$16 sps:$4 sm:$0xff]   ;;  %v3189_v34 = vld [vmem:[#allocation6 + $0xc0] ss:$16 sps:$4 sm:$0xff]  }
  0xa9   :  { %1064 = vmatprep.subr.bf16.mxu0 %v3137_v35  ;;  %1150 = vmatprep.subr.bf16.mxu1 %v3140_v36  ;;  %v3192_v35 = vld [vmem:[#allocation6 + $0xc8] ss:$16 sps:$4 sm:$0xff]   ;;  %v3197_v36 = vld [vmem:[#allocation6 + $0xe4] ss:$16 sps:$4 sm:$0xff]  }
  0xac   :  { %1065 = vmatpush1.bf16.msra.mxu0 %v3135_v38  ;;  %1151 = vmatpush1.bf16.msra.mxu1 %v3138_v39  ;;  %v3200_v38 = vld [vmem:[#allocation6 + $0xec] ss:$16 sps:$4 sm:$0xff]   ;;  %v3195_v39 = vld [vmem:[#allocation6 + $0xe0] ss:$16 sps:$4 sm:$0xff]  }
  0xad   :  { %1066 = vmatprep.subr.bf16.mxu0 %v3143_v40  ;;  %1152 = vmatprep.subr.bf16.mxu1 %v3146_v46  ;;  %v3198_v40 = vld [vmem:[#allocation6 + $0xe8] ss:$16 sps:$4 sm:$0xff]   ;;  %v3201_v46 = vld [vmem:[#allocation6 + $0x100] ss:$16 sps:$4 sm:$0xff]  }
  0xb0   :  { %1067 = vmatpush1.bf16.msra.mxu0 %v3141_v49  ;;  %1153 = vmatpush1.bf16.msra.mxu1 %v3144_v52  ;;  %v3204_v49 = vld [vmem:[#allocation6 + $0x108] ss:$16 sps:$4 sm:$0xff]   ;;  %v3207_v52 = vld [vmem:[#allocation6 + $0x120] ss:$16 sps:$4 sm:$0xff]  }
  0xb1   :  { %1068 = vmatprep.subr.bf16.mxu0 %v3149_v54  ;;  %1154 = vmatprep.subr.bf16.mxu1 %v3152_v53  ;;  %v3210_v54 = vld [vmem:[#allocation6 + $0x128] ss:$16 sps:$4 sm:$0xff]   ;;  %v3215_v53 = vld [vmem:[#allocation6 + $0x144] ss:$16 sps:$4 sm:$0xff]  }
  0xb4   :  { %1069 = vmatpush1.bf16.msra.mxu0 %v3147_v55  ;;  %1155 = vmatpush1.bf16.msra.mxu1 %v3150_v56  ;;  %v3218_v55 = vld [vmem:[#allocation6 + $0x14c] ss:$16 sps:$4 sm:$0xff]   ;;  %v3213_v56 = vld [vmem:[#allocation6 + $0x140] ss:$16 sps:$4 sm:$0xff]  }
  0xb5   :  { %1991 = vmatprep.subr.bf16.mxu0 %v3155_v60  ;;  %2077 = vmatprep.subr.bf16.mxu1 %v3158_v61  ;;  %v3216_v60 = vld [vmem:[#allocation6 + $0x148] ss:$16 sps:$4 sm:$0xff]   ;;  %v3221_v61 = vld [vmem:[#allocation6 + $0x164] ss:$16 sps:$4 sm:$0xff]  }
  0xb7   :  { %1071 = vmatmul.mubr.bf16.vlgmr.msra.gmra.mrb[0].mxu0 %v189_v4  ;;  %1157 = vmatmul.mubr.bf16.vlgmr.msra.gmra.mrb[0].mxu1 %v189_v4  ;;  %v3222_v4 = vld [vmem:[#allocation6 + $0x168] ss:$16 sps:$4 sm:$0xff]  }
  0xb8   :  { %1992 = vmatpush1.bf16.msra.mxu0 %v3153_v0  ;;  %2078 = vmatpush1.bf16.msra.mxu1 %v3156_v3  ;;  %v3224_v0 = vld [vmem:[#allocation6 + $0x16c] ss:$16 sps:$4 sm:$0xff]   ;;  %v3219_v3 = vld [vmem:[#allocation6 + $0x160] ss:$16 sps:$4 sm:$0xff]  }
  0xb9   :  { %1993 = vmatprep.subr.bf16.mxu0 %v3161_v6  ;;  %2079 = vmatprep.subr.bf16.mxu1 %v3164_v8  ;;  %v3227_v6 = vld [vmem:[#allocation6 + $0x184] ss:$16 sps:$4 sm:$0xff]   ;;  %v3230_v8 = vld [vmem:[#allocation6 + $0x18c] ss:$16 sps:$4 sm:$0xff]  }
  0xbc   :  { %1994 = vmatpush1.bf16.msra.mxu0 %v3159_v9  ;;  %2080 = vmatpush1.bf16.msra.mxu1 %v3162_v12  ;;  %v3225_v9 = vld [vmem:[#allocation6 + $0x180] ss:$16 sps:$4 sm:$0xff]   ;;  %v3228_v12 = vld [vmem:[#allocation6 + $0x188] ss:$16 sps:$4 sm:$0xff]  }
  0xbd   :  { %1995 = vmatprep.subr.bf16.mxu0 %v3167_v13  ;;  %2081 = vmatprep.subr.bf16.mxu1 %v3170_v14  ;;  %v3233_v13 = vld [vmem:[#allocation6 + $0x1a4] ss:$16 sps:$4 sm:$0xff]   ;;  %v3236_v14 = vld [vmem:[#allocation6 + $0x1ac] ss:$16 sps:$4 sm:$0xff]  }
  0xc0   :  { %1996 = vmatpush1.bf16.msra.mxu0 %v3165_v15  ;;  %2082 = vmatpush1.bf16.msra.mxu1 %v3168_v16  ;;  %v3231_v15 = vld [vmem:[#allocation6 + $0x1a0] ss:$16 sps:$4 sm:$0xff]   ;;  %v3234_v16 = vld [vmem:[#allocation6 + $0x1a8] ss:$16 sps:$4 sm:$0xff]  }
  0xc1   :  { %1997 = vmatprep.subr.bf16.mxu0 %v3173_v17  ;;  %2083 = vmatprep.subr.bf16.mxu1 %v3176_v18  ;;  %v3239_v17 = vld [vmem:[#allocation6 + $0x1c4] ss:$16 sps:$4 sm:$0xff]   ;;  %v3242_v18 = vld [vmem:[#allocation6 + $0x1cc] ss:$16 sps:$4 sm:$0xff]  }
  0xc4   :  { %1998 = vmatpush1.bf16.msra.mxu0 %v3171_v19  ;;  %2084 = vmatpush1.bf16.msra.mxu1 %v3174_v22  ;;  %v3237_v19 = vld [vmem:[#allocation6 + $0x1c0] ss:$16 sps:$4 sm:$0xff]   ;;  %v3240_v22 = vld [vmem:[#allocation6 + $0x1c8] ss:$16 sps:$4 sm:$0xff]  }
  0xc5   :  { %1999 = vmatprep.subr.bf16.mxu0 %v3179_v23  ;;  %2085 = vmatprep.subr.bf16.mxu1 %v3182_v24  ;;  %v3245_v23 = vld [vmem:[#allocation6 + $0x1e4] ss:$16 sps:$4 sm:$0xff]   ;;  %v3248_v24 = vld [vmem:[#allocation6 + $0x1ec] ss:$16 sps:$4 sm:$0xff]  }
  0xc8   :  { %2000 = vmatpush1.bf16.msra.mxu0 %v3177_v25  ;;  %2086 = vmatpush1.bf16.msra.mxu1 %v3180_v26  ;;  %v3243_v25 = vld [vmem:[#allocation6 + $0x1e0] ss:$16 sps:$4 sm:$0xff]   ;;  %v3246_v26 = vld [vmem:[#allocation6 + $0x1e8] ss:$16 sps:$4 sm:$0xff]  }
  0xc9   :  { %2001 = vmatprep.subr.bf16.mxu0 %v3185_v27  ;;  %2087 = vmatprep.subr.bf16.mxu1 %v3188_v28  ;;  %v3251_v27 = vld [vmem:[#allocation6 + $0x204] ss:$16 sps:$4 sm:$0xff]   ;;  %v3254_v28 = vld [vmem:[#allocation6 + $0x20c] ss:$16 sps:$4 sm:$0xff]  }
  0xcc   :  { %2002 = vmatpush1.bf16.msra.mxu0 %v3183_v29  ;;  %2088 = vmatpush1.bf16.msra.mxu1 %v3186_v30  ;;  %v2481_v29 = vmul.f32 %v3555_v11, %v3555_v11  ;;  %v3605_v30 = vld [vmem:[#allocation2 + $0x28] sm:$0xff]  ;;  %v2484_v11 = vmul.f32 %v3574_v63, %v3574_v63 }
  0xcd   :  { %2003 = vmatprep.subr.bf16.mxu0 %v3191_v31  ;;  %2089 = vmatprep.subr.bf16.mxu1 %v3194_v33  ;;  %v2482_v31 = vmul.f32 %v3605_v30, %v3605_v30  ;;  %v2483_v33 = vmul.f32 %v3593_v45, %v3593_v45  ;;  %v3631_v63 = vld [vmem:[%s3722_s4 + $0x8] sm:$0xff] }
  0xd0   :  { %2004 = vmatpush1.bf16.msra.mxu0 %v3189_v34  ;;  %2090 = vmatpush1.bf16.msra.mxu1 %v3192_v35  ;;  %v2477_v34 = vmul.f32 %v3553_v10, %v3553_v10  ;;  %v3613_v35 = vld [vmem:[#allocation2 + $0x8] sm:$0xff] }
  0xd1   :  { %2005 = vmatprep.subr.bf16.mxu0 %v3197_v36  ;;  %2091 = vmatprep.subr.bf16.mxu1 %v3200_v38  ;;  %v2478_v36 = vmul.f32 %v3613_v35, %v3613_v35  ;;  %v2479_v38 = vmul.f32 %v3591_v44, %v3591_v44 }
  0xd4   :  { %2006 = vmatpush1.bf16.msra.mxu0 %v3195_v39  ;;  %2092 = vmatpush1.bf16.msra.mxu1 %v3198_v40  ;;  %v2490_v39 = vadd.f32 %v2482_v31, %v2481_v29  ;;  %v2485_v40 = vadd.f32 %v2478_v36, %v2477_v34 }
  0xd5   :  { %2007 = vmatprep.subr.bf16.mxu0 %v3203_v41  ;;  %2093 = vmatprep.subr.bf16.mxu1 %v3206_v43  ;;  %v2480_v43 = vmul.f32 %v3572_v59, %v3572_v59 }
  0xd6   :  { %v2491_v41 = vadd.f32 %v2490_v39, %v2483_v33 }
  0xd8   :  { %2008 = vmatpush1.bf16.msra.mxu0 %v3201_v46  ;;  %2094 = vmatpush1.bf16.msra.mxu1 %v3204_v49  ;;  %v2486_v46 = vadd.f32 %v2485_v40, %v2479_v38  ;;  %v2492_v49 = vadd.f32 %v2491_v41, %v2484_v11 }
  0xd9   :  { %2009 = vmatprep.subr.bf16.mxu0 %v3209_v50  ;;  %2095 = vmatprep.subr.bf16.mxu1 %v3212_v51  ;;  %v3626_v50 = vld [vmem:[%s3722_s4] sm:$0xff]  ;;  %v325_v51 = vsub.s32 4, %v3521_v42 }
  0xda   :  { %2493 = vadd.xlane.f32.xlu0 %v2492_v49  ;;  %v2487_v10 = vadd.f32 %v2486_v46, %v2480_v43  ;;  %v322_v59 = vrot.slane %v3626_v50, %v3541_v62 }
  0xdc   :  { %2010 = vmatpush1.bf16.msra.mxu0 %v3207_v52  ;;  %2096 = vmatpush1.bf16.msra.mxu1 %v3210_v54  ;;  %v330_v52 = vrot.slane %v3631_v63, %v3541_v62  ;;  %v326_v54 = vrot.slane %v3626_v50, %v325_v51 }
  0xdd   :  { %2011 = vmatprep.subr.bf16.mxu0 %v3215_v53  ;;  %2097 = vmatprep.subr.bf16.mxu1 %v3218_v55  ;;  %v334_v53 = vrot.slane %v3631_v63, %v325_v51  ;;  %v342_v55 = vrot.slane %v322_v59, %v3541_v62  ;;  %v3252_v51 = vld [vmem:[#allocation6 + $0x208] ss:$16 sps:$4 sm:$0xff]  }
  0xde   :  { %2488 = vadd.xlane.f32.xlu0 %v2487_v10  ;;  %v3249_v10 = vld [vmem:[#allocation6 + $0x200] ss:$16 sps:$4 sm:$0xff]  }
  0xe0   :  { %2012 = vmatpush1.bf16.msra.mxu0 %v3213_v56  ;;  %2098 = vmatpush1.bf16.msra.mxu1 %v3216_v60  ;;  %v350_v56 = vrot.slane %v330_v52, %v3541_v62  ;;  %v346_v60 = vrot.slane %v326_v54, %v3541_v62  ;;  %v3257_v52 = vld [vmem:[#allocation6 + $0x224] ss:$16 sps:$4 sm:$0xff]   ;;  %v3260_v54 = vld [vmem:[#allocation6 + $0x22c] ss:$16 sps:$4 sm:$0xff]  }
  0xe1   :  { %2013 = vmatprep.subr.bf16.mxu0 %v3221_v61  ;;  %2099 = vmatprep.subr.bf16.mxu1 %v3224_v0  ;;  %v354_v61 = vrot.slane %v334_v53, %v3541_v62  ;;  %v3255_v53 = vld [vmem:[#allocation6 + $0x220] ss:$16 sps:$4 sm:$0xff]  }
  0xe4   :  { %2014 = vmatpush1.bf16.msra.mxu0 %v3219_v3  ;;  %2100 = vmatpush1.bf16.msra.mxu1 %v3222_v4 }
  0xe5   :  { %2015 = vmatprep.subr.bf16.mxu0 %v3227_v6  ;;  %2101 = vmatprep.subr.bf16.mxu1 %v3230_v8 }
  0xe8   :  { %2016 = vmatpush1.bf16.msra.mxu0 %v3225_v9  ;;  %2102 = vmatpush1.bf16.msra.mxu1 %v3228_v12 }
  0xe9   :  { %2017 = vmatprep.subr.bf16.mxu0 %v3233_v13  ;;  %2103 = vmatprep.subr.bf16.mxu1 %v3236_v14 }
  0xec   :  { %2018 = vmatpush1.bf16.msra.mxu0 %v3231_v15  ;;  %2104 = vmatpush1.bf16.msra.mxu1 %v3234_v16 }
  0xed   :  { %2019 = vmatprep.subr.bf16.mxu0 %v3239_v17  ;;  %2105 = vmatprep.subr.bf16.mxu1 %v3242_v18 }
  0xf0   :  { %2020 = vmatpush1.bf16.msra.mxu0 %v3237_v19  ;;  %2106 = vmatpush1.bf16.msra.mxu1 %v3240_v22 }
  0xf1   :  { %2021 = vmatprep.subr.bf16.mxu0 %v3245_v23  ;;  %2107 = vmatprep.subr.bf16.mxu1 %v3248_v24 }
  0xf4   :  { %2022 = vmatpush1.bf16.msra.mxu0 %v3243_v25  ;;  %2108 = vmatpush1.bf16.msra.mxu1 %v3246_v26 }
  0xf5   :  { %2034 = vmatprep.subr.bf16.mxu0 %v3251_v27  ;;  %2120 = vmatprep.subr.bf16.mxu1 %v3254_v28 }
 0x18a   :  { %v1072_v0 = vpop.f32.mrb[0].mxu0  ;;  %v1158_v3 = vpop.f32.mrb[0].mxu1 }
 0x18b   :  { %v2916_v4 = vadd.f32 %v1072_v0, %v342_v55  ;;  %v2920_v6 = vadd.f32 %v1158_v3, %v350_v56  ;;  %v1074_v8 = vpop.f32.mrb[1].mxu0  ;;  %v1160_v9 = vpop.f32.mrb[1].mxu1  ;;  %v3264_v0 = vld [vmem:[#allocation6 + $0x248] ss:$16 sps:$4 sm:$0xff]   ;;  %v3269_v3 = vld [vmem:[#allocation6 + $0x264] ss:$16 sps:$4 sm:$0xff]  }
 0x18c   :  { %v2917_v12 = vadd.f32 %v1074_v8, %v346_v60  ;;  %v2921_v13 = vadd.f32 %v1160_v9, %v354_v61  ;;  %v1076_v14 = vpop.f32.mrb[2].mxu0  ;;  %v1162_v15 = vpop.f32.mrb[2].mxu1  ;;  %v3270_v8 = vld [vmem:[#allocation6 + $0x268] ss:$16 sps:$4 sm:$0xff]   ;;  %v3275_v9 = vld [vmem:[#allocation6 + $0x284] ss:$16 sps:$4 sm:$0xff]  }
 0x18d   :  { %v1167_v16 = vmul.f32 0.1, %v2916_v4  ;;  %v1169_v17 = vmul.f32 0.1, %v2920_v6  ;;  %v2918_v18 = vadd.f32 %v1076_v14, %v342_v55  ;;  %v2922_v19 = vadd.f32 %v1162_v15, %v350_v56  ;;  %v1078_v22 = vpop.f32.mrb[3].mxu0  ;;  %v1164_v23 = vpop.f32.mrb[3].mxu1 }
 0x18e   :  { %v1168_v24 = vmul.f32 0.1, %v2917_v12  ;;  %v1170_v25 = vmul.f32 0.1, %v2921_v13  ;;  %v2919_v26 = vadd.f32 %v1078_v22, %v346_v60  ;;  %v2923_v62 = vadd.f32 %v1164_v23, %v354_v61  ;;  %v3258_v55 = vld [vmem:[#allocation6 + $0x228] ss:$16 sps:$4 sm:$0xff]  }
 0x18f   :  { %v1171_v27 = vmul.f32 0.1, %v2918_v18  ;;  %v1173_v28 = vmul.f32 0.1, %v2922_v19  ;;  %v1175_v33 = vmax.f32 %v2916_v4, %v1167_v16  ;;  %v1177_v34 = vmax.f32 %v2920_v6, %v1169_v17  ;;  %v3263_v56 = vld [vmem:[#allocation6 + $0x244] ss:$16 sps:$4 sm:$0xff]  }
 0x190   :  { %v1172_v29 = vmul.f32 0.1, %v2919_v26  ;;  %v1174_v31 = vmul.f32 0.1, %v2923_v62  ;;  %v1176_v11 = vmax.f32 %v2917_v12, %v1168_v24  ;;  %v1178_v39 = vmax.f32 %v2921_v13, %v1170_v25  ;;  %v3266_v60 = vld [vmem:[#allocation6 + $0x24c] ss:$16 sps:$4 sm:$0xff]  }
 0x191   :  { %v1179_v36 = vmax.f32 %v2918_v18, %v1171_v27  ;;  %v1181_v38 = vmax.f32 %v2922_v19, %v1173_v28  ;;  %v3261_v61 = vld [vmem:[#allocation6 + $0x240] ss:$16 sps:$4 sm:$0xff]   ;;  %v3272_v4 = vld [vmem:[#allocation6 + $0x26c] ss:$16 sps:$4 sm:$0xff]   ;;  %v3276_v14 = vld [vmem:[#allocation6 + $0x288] ss:$16 sps:$4 sm:$0xff]  }
 0x192   :  { %v1180_v40 = vmax.f32 %v2919_v26, %v1172_v29  ;;  %v1182_v41 = vmax.f32 %v2923_v62, %v1174_v31  ;;  %v3267_v6 = vld [vmem:[#allocation6 + $0x260] ss:$16 sps:$4 sm:$0xff]   ;;  %v3278_v12 = vld [vmem:[#allocation6 + $0x28c] ss:$16 sps:$4 sm:$0xff]   ;;  %v3281_v15 = vld [vmem:[#allocation6 + $0x2a4] ss:$16 sps:$4 sm:$0xff]  }
 0x193   :  { %v1183_v43 = vpack.c.bf16 %v1179_v36, %v1175_v33  ;;  %v3644_v46 = vpack.c.bf16 %v1181_v38, %v1177_v34  ;;  %v3273_v13 = vld [vmem:[#allocation6 + $0x280] ss:$16 sps:$4 sm:$0xff]   ;;  %v3284_v16 = vld [vmem:[#allocation6 + $0x2ac] ss:$16 sps:$4 sm:$0xff]   ;;  %v3282_v18 = vld [vmem:[#allocation6 + $0x2a8] ss:$16 sps:$4 sm:$0xff]  }
 0x194   :  { %v1184_v49 = vpack.c.bf16 %v1180_v40, %v1176_v11  ;;  %v1186_v59 = vpack.c.bf16 %v1182_v41, %v1178_v39  ;;  %v3279_v17 = vld [vmem:[#allocation6 + $0x2a0] ss:$16 sps:$4 sm:$0xff]   ;;  %v3287_v19 = vld [vmem:[#allocation6 + $0x2c4] ss:$16 sps:$4 sm:$0xff]   ;;  %v3290_v22 = vld [vmem:[#allocation6 + $0x2cc] ss:$16 sps:$4 sm:$0xff]  }
 0x195   :  { %v3285_v23 = vld [vmem:[#allocation6 + $0x2c0] ss:$16 sps:$4 sm:$0xff]   ;;  %v3288_v24 = vld [vmem:[#allocation6 + $0x2c8] ss:$16 sps:$4 sm:$0xff]   ;;  %v3293_v25 = vld [vmem:[#allocation6 + $0x2e4] ss:$16 sps:$4 sm:$0xff]  }
 0x196   :  { %2023 = vmatprep.mubr.bf16.mxu0 %v1184_v49  ;;  %2109 = vmatprep.mubr.bf16.mxu1 %v1184_v49  ;;  %v3296_v26 = vld [vmem:[#allocation6 + $0x2ec] ss:$16 sps:$4 sm:$0xff]   ;;  %v3291_v62 = vld [vmem:[#allocation6 + $0x2e0] ss:$16 sps:$4 sm:$0xff]   ;;  %v3294_v27 = vld [vmem:[#allocation6 + $0x2e8] ss:$16 sps:$4 sm:$0xff]  }
 0x197   :  { %2024 = vmatmul.mubr.bf16.vlgmr.msra.gmra.mrb[4].mxu0 %v1183_v43  ;;  %2110 = vmatmul.mubr.bf16.vlgmr.msra.gmra.mrb[4].mxu1 %v1183_v43  ;;  %v3299_v28 = vld [vmem:[#allocation6 + $0x304] ss:$16 sps:$4 sm:$0xff]   ;;  %v3302_v29 = vld [vmem:[#allocation6 + $0x30c] ss:$16 sps:$4 sm:$0xff]   ;;  %v3297_v31 = vld [vmem:[#allocation6 + $0x300] ss:$16 sps:$4 sm:$0xff]  }
 0x198   :  { %2035 = vmatpush1.bf16.msra.mxu0 %v3249_v10  ;;  %2121 = vmatpush1.bf16.msra.mxu1 %v3252_v51  ;;  %v3300_v33 = vld [vmem:[#allocation6 + $0x308] ss:$16 sps:$4 sm:$0xff]   ;;  %v3305_v34 = vld [vmem:[#allocation6 + $0x324] ss:$16 sps:$4 sm:$0xff]   ;;  %v3308_v36 = vld [vmem:[#allocation6 + $0x32c] ss:$16 sps:$4 sm:$0xff]  }
 0x199   :  { %2066 = vmatprep.mubr.bf16.mxu0 %v1186_v59  ;;  %2152 = vmatprep.mubr.bf16.mxu1 %v1186_v59  ;;  %v3303_v38 = vld [vmem:[#allocation6 + $0x320] ss:$16 sps:$4 sm:$0xff]   ;;  %v3306_v11 = vld [vmem:[#allocation6 + $0x328] ss:$16 sps:$4 sm:$0xff]   ;;  %v3311_v39 = vld [vmem:[#allocation6 + $0x344] ss:$16 sps:$4 sm:$0xff]  }
 0x19a   :  { %2036 = vmatprep.subr.bf16.mxu0 %v3257_v52  ;;  %2122 = vmatprep.subr.bf16.mxu1 %v3260_v54  ;;  %v3314_v40 = vld [vmem:[#allocation6 + $0x34c] ss:$16 sps:$4 sm:$0xff]   ;;  %v3309_v41 = vld [vmem:[#allocation6 + $0x340] ss:$16 sps:$4 sm:$0xff]   ;;  %v3312_v43 = vld [vmem:[#allocation6 + $0x348] ss:$16 sps:$4 sm:$0xff]  }
 0x19b   :  { %v3317_v49 = vld [vmem:[#allocation6 + $0x364] ss:$16 sps:$4 sm:$0xff]   ;;  %v3320_v10 = vld [vmem:[#allocation6 + $0x36c] ss:$16 sps:$4 sm:$0xff]   ;;  %v3315_v51 = vld [vmem:[#allocation6 + $0x360] ss:$16 sps:$4 sm:$0xff]  }
 0x19c   :  { %2037 = vmatpush1.bf16.msra.mxu0 %v3255_v53  ;;  %2123 = vmatpush1.bf16.msra.mxu1 %v3258_v55  ;;  %v3318_v59 = vld [vmem:[#allocation6 + $0x368] ss:$16 sps:$4 sm:$0xff]   ;;  %v3323_v52 = vld [vmem:[#allocation6 + $0x384] ss:$16 sps:$4 sm:$0xff]   ;;  %v3326_v54 = vld [vmem:[#allocation6 + $0x38c] ss:$16 sps:$4 sm:$0xff]  }
 0x19d   :  { %2038 = vmatprep.subr.bf16.mxu0 %v3263_v56  ;;  %2124 = vmatprep.subr.bf16.mxu1 %v3266_v60  ;;  %v3321_v53 = vld [vmem:[#allocation6 + $0x380] ss:$16 sps:$4 sm:$0xff]   ;;  %v3324_v55 = vld [vmem:[#allocation6 + $0x388] ss:$16 sps:$4 sm:$0xff]   ;;  %v3329_v56 = vld [vmem:[#allocation6 + $0x3a4] ss:$16 sps:$4 sm:$0xff]  }
 0x19e   :  { %v3332_v60 = vld [vmem:[#allocation6 + $0x3ac] ss:$16 sps:$4 sm:$0xff]  }
 0x1a0   :  { %2039 = vmatpush1.bf16.msra.mxu0 %v3261_v61  ;;  %2125 = vmatpush1.bf16.msra.mxu1 %v3264_v0  ;;  %v3327_v61 = vld [vmem:[#allocation6 + $0x3a0] ss:$16 sps:$4 sm:$0xff]   ;;  %v3330_v0 = vld [vmem:[#allocation6 + $0x3a8] ss:$16 sps:$4 sm:$0xff]  }
 0x1a1   :  { %2040 = vmatprep.subr.bf16.mxu0 %v3269_v3  ;;  %2126 = vmatprep.subr.bf16.mxu1 %v3272_v4  ;;  %v3335_v3 = vld [vmem:[#allocation6 + $0x3c4] ss:$16 sps:$4 sm:$0xff]   ;;  %v3338_v4 = vld [vmem:[#allocation6 + $0x3cc] ss:$16 sps:$4 sm:$0xff]  }
 0x1a4   :  { %2041 = vmatpush1.bf16.msra.mxu0 %v3267_v6  ;;  %2127 = vmatpush1.bf16.msra.mxu1 %v3270_v8  ;;  %v3333_v6 = vld [vmem:[#allocation6 + $0x3c0] ss:$16 sps:$4 sm:$0xff]   ;;  %v3336_v8 = vld [vmem:[#allocation6 + $0x3c8] ss:$16 sps:$4 sm:$0xff]  }
 0x1a5   :  { %2042 = vmatprep.subr.bf16.mxu0 %v3275_v9  ;;  %2128 = vmatprep.subr.bf16.mxu1 %v3278_v12  ;;  %v3341_v9 = vld [vmem:[#allocation6 + $0x3e4] ss:$16 sps:$4 sm:$0xff]   ;;  %v3344_v12 = vld [vmem:[#allocation6 + $0x3ec] ss:$16 sps:$4 sm:$0xff]  }
 0x1a8   :  { %2043 = vmatpush1.bf16.msra.mxu0 %v3273_v13  ;;  %2129 = vmatpush1.bf16.msra.mxu1 %v3276_v14  ;;  %v3339_v13 = vld [vmem:[#allocation6 + $0x3e0] ss:$16 sps:$4 sm:$0xff]   ;;  %v3342_v14 = vld [vmem:[#allocation6 + $0x3e8] ss:$16 sps:$4 sm:$0xff]  }
 0x1a9   :  { %2044 = vmatprep.subr.bf16.mxu0 %v3281_v15  ;;  %2130 = vmatprep.subr.bf16.mxu1 %v3284_v16  ;;  %v3367_v15 = vld [vmem:[#allocation2 + $0x20] sm:$0xff] }
 0x1aa   :  { %v3368_v16 = vld [vmem:[#allocation2] sm:$0xff] }
 0x1ac   :  { %2045 = vmatpush1.bf16.msra.mxu0 %v3279_v17  ;;  %2131 = vmatpush1.bf16.msra.mxu1 %v3282_v18  ;;  %v3369_v17 = vld [vmem:[#allocation2 + $0x38] sm:$0xff] }
 0x1ad   :  { %2046 = vmatprep.subr.bf16.mxu0 %v3287_v19  ;;  %2132 = vmatprep.subr.bf16.mxu1 %v3290_v22  ;;  %v3370_v18 = vld [vmem:[#allocation2 + $0x18] sm:$0xff]  ;;  %v144_v19 = vrot.slane %v3631_v63, %v3585_v32 }
 0x1b0   :  { %2047 = vmatpush1.bf16.msra.mxu0 %v3285_v23  ;;  %2133 = vmatpush1.bf16.msra.mxu1 %v3288_v24 }
 0x1b1   :  { %2048 = vmatprep.subr.bf16.mxu0 %v3293_v25  ;;  %2134 = vmatprep.subr.bf16.mxu1 %v3296_v26 }
 0x1b4   :  { %2049 = vmatpush1.bf16.msra.mxu0 %v3291_v62  ;;  %2135 = vmatpush1.bf16.msra.mxu1 %v3294_v27 }
 0x1b5   :  { %2050 = vmatprep.subr.bf16.mxu0 %v3299_v28  ;;  %2136 = vmatprep.subr.bf16.mxu1 %v3302_v29 }
 0x1b8   :  { %2051 = vmatpush1.bf16.msra.mxu0 %v3297_v31  ;;  %2137 = vmatpush1.bf16.msra.mxu1 %v3300_v33  ;;  %v1321_v33 = vsub.s32 5, %v3521_v42 }
 0x1b9   :  { %2052 = vmatprep.subr.bf16.mxu0 %v3305_v34  ;;  %2138 = vmatprep.subr.bf16.mxu1 %v3308_v36 }
 0x1bc   :  { %2053 = vmatpush1.bf16.msra.mxu0 %v3303_v38  ;;  %2139 = vmatpush1.bf16.msra.mxu1 %v3306_v11 }
 0x1bd   :  { %2054 = vmatprep.subr.bf16.mxu0 %v3311_v39  ;;  %2140 = vmatprep.subr.bf16.mxu1 %v3314_v40 }
 0x1c0   :  { %2055 = vmatpush1.bf16.msra.mxu0 %v3309_v41  ;;  %2141 = vmatpush1.bf16.msra.mxu1 %v3312_v43 }
 0x1c1   :  { %2056 = vmatprep.subr.bf16.mxu0 %v3317_v49  ;;  %2142 = vmatprep.subr.bf16.mxu1 %v3320_v10 }
 0x1c4   :  { %2057 = vmatpush1.bf16.msra.mxu0 %v3315_v51  ;;  %2143 = vmatpush1.bf16.msra.mxu1 %v3318_v59 }
 0x1c5   :  { %2058 = vmatprep.subr.bf16.mxu0 %v3323_v52  ;;  %2144 = vmatprep.subr.bf16.mxu1 %v3326_v54 }
 0x1c8   :  { %2059 = vmatpush1.bf16.msra.mxu0 %v3321_v53  ;;  %2145 = vmatpush1.bf16.msra.mxu1 %v3324_v55 }
 0x1c9   :  { %2060 = vmatprep.subr.bf16.mxu0 %v3329_v56  ;;  %2146 = vmatprep.subr.bf16.mxu1 %v3332_v60 }
 0x1cc   :  { %2061 = vmatpush1.bf16.msra.mxu0 %v3327_v61  ;;  %2147 = vmatpush1.bf16.msra.mxu1 %v3330_v0 }
 0x1cd   :  { %2062 = vmatprep.subr.bf16.mxu0 %v3335_v3  ;;  %2148 = vmatprep.subr.bf16.mxu1 %v3338_v4 }
 0x1d0   :  { %2063 = vmatpush1.bf16.msra.mxu0 %v3333_v6  ;;  %2149 = vmatpush1.bf16.msra.mxu1 %v3336_v8 }
 0x1d1   :  { %2064 = vmatprep.subr.bf16.mxu0 %v3341_v9  ;;  %2150 = vmatprep.subr.bf16.mxu1 %v3344_v12 }
 0x1d4   :  { %2065 = vmatpush1.bf16.msra.mxu0 %v3339_v13  ;;  %2151 = vmatpush1.bf16.msra.mxu1 %v3342_v14 }
 0x1d5   :  { %2337 = vmatprep.subr.mxu1 %v3605_v30  ;;  %2197 = vmatprep.subr.mxu0 %v3613_v35 }
 0x1d7   :  { %2067 = vmatmul.mubr.bf16.vlgmr.msra.gmra.mrb[4].mxu0 %v3644_v46  ;;  %2153 = vmatmul.mubr.bf16.vlgmr.msra.gmra.mrb[4].mxu1 %v3644_v46  ;;  %v136_v46 = vrot.slane %v3626_v50, %v3585_v32 }
 0x1d8   :  { %2401 = vmatprep.mubr.f32.mxu1 %v3605_v30  ;;  %2261 = vmatprep.mubr.f32.mxu0 %v3613_v35  ;;  %v139_v30 = vsub.s32 6, %v3521_v42 }
 0x1da   :  { %v140_v35 = vrot.slane %v3626_v50, %v139_v30  ;;  %v148_v23 = vrot.slane %v3631_v63, %v139_v30 }
 0x1dc   :  { %v160_v22 = vrot.slane %v140_v35, %v3585_v32  ;;  %v3670_v25 = vrot.slane %v148_v23, %v3585_v32 }
 0x1dd   :  { %2338 = vmatpush1.xpose.msra.mxu1 %v3367_v15  ;;  %2198 = vmatpush1.xpose.msra.mxu0 %v3368_v16 }
 0x1de   :  { %2407 = vmatprep.subr.mxu1 %v3369_v17  ;;  %2267 = vmatprep.subr.mxu0 %v3370_v18  ;;  %v174_v24 = vmul.f32 %v160_v22, %v3545_v2  ;;  %v176_v27 = vmul.f32 %v3670_v25, %v3580_v7  ;;  %v2627_v2 = vrot.slane %v3626_v50, %v3566_v48 }
 0x1df   :  { %v1330_v7 = vrot.slane %v3631_v63, %v1321_v33  ;;  %v170_v35 = vmul.f32 %v160_v22, %v3543_v1 }
 0x1e0   :  { %2402 = vmatmul.mubr.f32.vlgmr.msra.gmra.mrb[8].mxu1 %v3367_v15  ;;  %2262 = vmatmul.mubr.f32.vlgmr.msra.gmra.mrb[8].mxu0 %v3368_v16  ;;  %2952 = vpush %v2627_v2 }
 0x1e1   :  { %2408 = vmatpush1.xpose.msra.mxu1 %v3593_v45  ;;  %2268 = vmatpush1.xpose.msra.mxu0 %v3591_v44  ;;  %v1350_v48 = vrot.slane %v1330_v7, %v3524_v47  ;;  %v172_v7 = vmul.f32 %v3670_v25, %v3578_v5 }
 0x1e2   :  { %2471 = vmatprep.mubr.f32.mxu1 %v3369_v17  ;;  %2331 = vmatprep.mubr.f32.mxu0 %v3370_v18 }
 0x1e8   :  { %2472 = vmatmul.mubr.f32.vlgmr.msra.gmra.mrb[8].mxu1 %v3593_v45  ;;  %2332 = vmatmul.mubr.f32.vlgmr.msra.gmra.mrb[8].mxu0 %v3591_v44  ;;  %v156_v45 = vrot.slane %v136_v46, %v3585_v32  ;;  %v3667_v44 = vrot.slane %v144_v19, %v3585_v32  ;;  %v1318_v32 = vrot.slane %v3626_v50, %v3524_v47 }
 0x1ea   :  { %v173_v26 = vmul.f32 %v156_v45, %v3561_v21  ;;  %v175_v62 = vmul.f32 %v3667_v44, %v3599_v58  ;;  %v1326_v21 = vrot.slane %v3631_v63, %v3524_v47  ;;  %v1322_v58 = vrot.slane %v3626_v50, %v1321_v33 }
 0x1eb   :  { %v1338_v34 = vrot.slane %v1318_v32, %v3524_v47  ;;  %v169_v19 = vmul.f32 %v156_v45, %v3559_v20  ;;  %v171_v2 = vmul.f32 %v3667_v44, %v3597_v57 }
 0x1ec   :  { %v182_v28 = vadd.f32 %v174_v24, %v173_v26  ;;  %v1346_v36 = vrot.slane %v1326_v21, %v3524_v47  ;;  %v1342_v38 = vrot.slane %v1322_v58, %v3524_v47 }
 0x1ed   :  { %v177_v21 = vadd.f32 %v170_v35, %v169_v19 }
 0x1ee   :  { %v183_v29 = vadd.f32 %v182_v28, %v175_v62 }
 0x1f0   :  { %v184_v31 = vadd.f32 %v183_v29, %v176_v27 }
 0x1f2   :  { %185 = vadd.xlane.f32.xlu0 %v184_v31 }
 0x211   :  { %s2953_s4 = spop %2952 }
 0x2aa   :  { %v2068_v11 = vpop.f32.mrb[4].mxu0  ;;  %v2154_v39 = vpop.f32.mrb[4].mxu1 }
 0x2ab   :  { %v2924_v40 = vadd.f32 %v2068_v11, %v1338_v34  ;;  %v2928_v41 = vadd.f32 %v2154_v39, %v1346_v36  ;;  %v2070_v43 = vpop.f32.mrb[5].mxu0  ;;  %v2156_v49 = vpop.f32.mrb[5].mxu1 }
 0x2ac   :  { %v2925_v10 = vadd.f32 %v2070_v43, %v1342_v38  ;;  %v2929_v51 = vadd.f32 %v2156_v49, %v1350_v48  ;;  %v2072_v59 = vpop.f32.mrb[6].mxu0  ;;  %v2158_v50 = vpop.f32.mrb[6].mxu1 }
 0x2ad   :  { %v2163_v52 = vmul.f32 0.1, %v2924_v40  ;;  %v2165_v63 = vmul.f32 0.1, %v2928_v41  ;;  %v2926_v54 = vadd.f32 %v2072_v59, %v1338_v34  ;;  %v2930_v53 = vadd.f32 %v2158_v50, %v1346_v36  ;;  %v2074_v55 = vpop.f32.mrb[7].mxu0  ;;  %v2160_v56 = vpop.f32.mrb[7].mxu1 }
 0x2ae   :  { %v2164_v60 = vmul.f32 0.1, %v2925_v10  ;;  %v2166_v61 = vmul.f32 0.1, %v2929_v51  ;;  %v2927_v0 = vadd.f32 %v2074_v55, %v1342_v38  ;;  %v2931_v47 = vadd.f32 %v2160_v56, %v1350_v48  ;;  %v2494_v48 = vpop.xlane.xlu0 %2493 }
 0x2af   :  { %v2171_v3 = vmax.f32 %v2924_v40, %v2163_v52  ;;  %v2167_v4 = vmul.f32 0.1, %v2926_v54  ;;  %v2169_v6 = vmul.f32 0.1, %v2930_v53  ;;  %v2173_v8 = vmax.f32 %v2928_v41, %v2165_v63 }
 0x2b0   :  { %v2172_v9 = vmax.f32 %v2925_v10, %v2164_v60  ;;  %v2168_v12 = vmul.f32 0.1, %v2927_v0  ;;  %v2170_v13 = vmul.f32 0.1, %v2931_v47  ;;  %v2174_v17 = vmax.f32 %v2929_v51, %v2166_v61 }
 0x2b1   :  { %v2179_v14 = vmul.f32 %v2171_v3, %v156_v45  ;;  %v2175_v15 = vmax.f32 %v2926_v54, %v2167_v4  ;;  %v2177_v18 = vmax.f32 %v2930_v53, %v2169_v6  ;;  %v2181_v23 = vmul.f32 %v2173_v8, %v3667_v44 }
 0x2b2   :  { %v2180_v16 = vmul.f32 %v2172_v9, %v160_v22  ;;  %v2176_v30 = vmax.f32 %v2927_v0, %v2168_v12  ;;  %v2178_v26 = vmax.f32 %v2931_v47, %v2170_v13  ;;  %v2182_v29 = vmul.f32 %v2174_v17, %v3670_v25  ;;  %v2489_v39 = vpop.xlane.xlu0 %2488 }
 0x2b3   :  { %v2183_v46 = vmul.f32 %v2175_v15, %v156_v45  ;;  %v2185_v27 = vmul.f32 %v2177_v18, %v3667_v44  ;;  %v178_v34 = vadd.f32 %v177_v21, %v171_v2 }
 0x2b4   :  { %v2184_v24 = vmul.f32 %v2176_v30, %v160_v22  ;;  %v2187_v62 = vadd.f32 %v2180_v16, %v2179_v14  ;;  %v2186_v33 = vmul.f32 %v2178_v26, %v3670_v25  ;;  %v2498_v22 = vand.u32 127, %v75_v37 }
 0x2b5   :  { %v179_v44 = vadd.f32 %v178_v34, %v172_v7 }
 0x2b6   :  { %v2192_v28 = vadd.f32 %v2184_v24, %v2183_v46  ;;  %v2188_v31 = vadd.f32 %v2187_v62, %v2181_v23  ;;  %v3702_v57 = vsub.s32 %v2498_v22, %v3521_v42  ;;  %vm2544_vm0 = vcmp.eq.s32.totalorder %v3521_v42, %v2498_v22 }
 0x2b8   :  { %v2193_v1 = vadd.f32 %v2192_v28, %v2185_v27  ;;  %v2189_v32 = vadd.f32 %v2188_v31, %v2182_v29  ;;  %v2506_v11 = vrot.slane %v2494_v48, %v3702_v57  ;;  %v2502_v41 = vrot.slane %v2489_v39, %v3702_v57 }
 0x2ba   :  { %v2194_v20 = vadd.f32 %v2193_v1, %v2186_v33  ;;  %v2529_v40 = vadd.f32 %v2506_v11, %v2494_v48  ;;  %v2528_v43 = vadd.f32 %v2502_v41, %v2489_v39 }
 0x2bb   :  { %v2473_v45 = vpop.f32.mrb[8].mxu1  ;;  %v2333_v58 = vpop.f32.mrb[8].mxu0 }
 0x2bc   :  { %2195 = vadd.xlane.f32.xlu1 %v2194_v20  ;;  %v2475_v36 = vpop.f32.mrb[9].mxu1  ;;  %v2335_v38 = vpop.f32.mrb[9].mxu0  ;;  %v2531_v37 = vmul.f32 2.0, %v2473_v45  ;;  %v2530_v5 = vmul.f32 2.0, %v2333_v58 }
 0x2be   :  { %v2533_v49 = vsub.f32 %v2529_v40, %v2531_v37  ;;  %v2532_v10 = vsub.f32 %v2528_v43, %v2530_v5  ;;  %v186_v37 = vpop.xlane.xlu0 %185 }
 0x2c0   :  { %2190 = vadd.xlane.f32.xlu1 %v2189_v32  ;;  %v2535_v25 = vmax.f32 %v2533_v49, 0.0  ;;  %v2534_v59 = vmax.f32 %v2532_v10, 0.0  ;;  %v2609_v10 = vmul.f32 0.9, %v186_v37 }
 0x2c2   :  { %v2537_v51 = vsub.f32 0.0, %v2535_v25  ;;  %v2536_v52 = vsub.f32 0.0, %v2534_v59 }
 0x2c4   :  { %180 = vadd.xlane.f32.xlu1 %v179_v44  ;;  %v2540_v50 = vmul.f32 1.442695, %v2537_v51  ;;  %v2538_v63 = vmul.f32 1.442695, %v2536_v52 }
 0x2c6   :  { %3345 = vpow2.f32 %v2540_v50 }
 0x2c7   :  { %3347 = vpow2.f32 %v2538_v63  ;;  %v2619_v63 = vrot.slane %v2609_v10, %v3702_v57 }
 0x2d0   :  { %v3346_v54 = vpop.eup %3345 }
 0x2d1   :  { %v2546_v53 = vmul.f32 -99.0, %v3346_v54  ;;  %v3348_v55 = vpop.eup %3347 }
 0x2d2   :  { %v2545_v56 = vmul.f32 -99.0, %v3348_v55 }
 0x2d3   :  { %v2550_v60 = vsel %vm2544_vm0, %v2546_v53, %v3346_v54 }
 0x2d4   :  { %v2559_v61 = vsel %vm2551_vm1, %v2550_v60, -inf  ;;  %v2549_v0 = vsel %vm2544_vm0, %v2545_v56, %v3348_v55 }
 0x2d5   :  { %v2560_v47 = vrot.slane %v2559_v61, 4  ;;  %v2552_v3 = vsel %vm2551_vm1, %v2549_v0, -inf }
 0x2d6   :  { %v2553_v6 = vrot.slane %v2552_v3, 4 }
 0x2d7   :  { %v2561_v4 = vmax.f32 %v2559_v61, %v2560_v47 }
 0x2d8   :  { %v2554_v9 = vmax.f32 %v2552_v3, %v2553_v6 }
 0x2d9   :  { %v2562_v8 = vrot.slane %v2561_v4, 2 }
 0x2da   :  { %v2555_v13 = vrot.slane %v2554_v9, 2 }
 0x2db   :  { %v2563_v12 = vmax.f32 %v2561_v4, %v2562_v8 }
 0x2dc   :  { %v2556_v15 = vmax.f32 %v2554_v9, %v2555_v13 }
 0x2dd   :  { %v2564_v14 = vrot.slane %v2563_v12, 1 }
 0x2de   :  { %v2557_v17 = vrot.slane %v2556_v15, 1 }
 0x2df   :  { %v2565_v16 = vmax.f32 %v2563_v12, %v2564_v14 }
 0x2e0   :  { %v2558_v18 = vmax.f32 %v2556_v15, %v2557_v17 }
 0x2e1   :  { %v2567_v42 = vsub.f32 %v2550_v60, %v2565_v16  ;;  %v2629_v60 = vstv %s2953_s4 }
 0x2e2   :  { %v2566_v35 = vsub.f32 %v2549_v0, %v2558_v18 }
 0x2e3   :  { %v2570_v30 = vmul.f32 1.442695, %v2567_v42 }
 0x2e4   :  { %v2568_v46 = vmul.f32 1.442695, %v2566_v35 }
 0x2e5   :  { %3349 = vpow2.f32 %v2570_v30 }
 0x2e6   :  { %3351 = vpow2.f32 %v2568_v46 }
 0x2ef   :  { %v3350_v19 = vpop.eup %3349 }
 0x2f0   :  { %v2579_v23 = vsel %vm2551_vm1, %v3350_v19, 0.0  ;;  %v3352_v24 = vpop.eup %3351 }
 0x2f1   :  { %v2580_v26 = vrot.slane %v2579_v23, 4  ;;  %v2572_v62 = vsel %vm2551_vm1, %v3352_v24, 0.0 }
 0x2f2   :  { %v2573_v28 = vrot.slane %v2572_v62, 4 }
 0x2f3   :  { %v2581_v27 = vadd.f32 %v2580_v26, %v2579_v23 }
 0x2f4   :  { %v2574_v31 = vadd.f32 %v2573_v28, %v2572_v62 }
 0x2f5   :  { %v2582_v29 = vrot.slane %v2581_v27, 2 }
 0x2f6   :  { %v2575_v33 = vrot.slane %v2574_v31, 2 }
 0x2f7   :  { %v2583_v2 = vadd.f32 %v2582_v29, %v2581_v27 }
 0x2f8   :  { %v2576_v32 = vadd.f32 %v2575_v33, %v2574_v31 }
 0x2f9   :  { %v2584_v1 = vrot.slane %v2583_v2, 1 }
 0x2fa   :  { %v2577_v20 = vrot.slane %v2576_v32, 1 }
 0x2fb   :  { %v2585_v21 = vadd.f32 %v2584_v1, %v2583_v2 }
 0x2fc   :  { %v2578_v45 = vadd.f32 %v2577_v20, %v2576_v32 }
 0x2fd   :  { %3353 = vrcp.f32 %v2585_v21 }
 0x2fe   :  { %3355 = vrcp.f32 %v2578_v45 }
 0x307   :  { %v3354_v58 = vpop.eup %3353 }
 0x308   :  { %v2589_v22 = vmul.f32 %v3354_v58, %v3350_v19  ;;  %v3356_v7 = vpop.eup %3355 }
 0x309   :  { %v2587_v48 = vmul.f32 %v3356_v7, %v3352_v24 }
 0x349   :  { %v2196_v34 = vpop.xlane.xlu1 %2195 }
 0x34a   :  { %v2591_v36 = vmul.f32 %v2589_v22, %v2196_v34 }
 0x34c   :  { %v2599_v38 = vsel %vm2551_vm1, %v2591_v36, 0.0 }
 0x34d   :  { %v2600_v44 = vrot.slane %v2599_v38, 4  ;;  %v2191_v11 = vpop.xlane.xlu1 %2190 }
 0x34e   :  { %v2590_v39 = vmul.f32 %v2587_v48, %v2191_v11 }
 0x34f   :  { %v2601_v40 = vadd.f32 %v2600_v44, %v2599_v38 }
 0x350   :  { %v2592_v41 = vsel %vm2551_vm1, %v2590_v39, 0.0 }
 0x351   :  { %v2602_v43 = vrot.slane %v2601_v40, 2  ;;  %v2593_v49 = vrot.slane %v2592_v41, 4  ;;  %v181_v51 = vpop.xlane.xlu1 %180 }
 0x352   :  { %v2608_v54 = vmul.f32 0.9, %v181_v51 }
 0x353   :  { %v2603_v5 = vadd.f32 %v2602_v43, %v2601_v40  ;;  %v2594_v25 = vadd.f32 %v2593_v49, %v2592_v41 }
 0x354   :  { %v2615_v61 = vrot.slane %v2608_v54, %v3702_v57 }
 0x355   :  { %v2595_v59 = vrot.slane %v2594_v25, 2  ;;  %v2604_v50 = vrot.slane %v2603_v5, 1 }
 0x357   :  { %v2596_v52 = vadd.f32 %v2595_v59, %v2594_v25  ;;  %v2605_v53 = vadd.f32 %v2604_v50, %v2603_v5 }
 0x359   :  { %v2597_v55 = vrot.slane %v2596_v52, 1  ;;  %v2607_v56 = vmul.f32 0.1, %v2605_v53 }
 0x35b   :  { %v2598_v0 = vadd.f32 %v2597_v55, %v2596_v52  ;;  %v2623_v47 = vadd.f32 %v2619_v63, %v2607_v56 }
 0x35d   :  { %v2606_v3 = vmul.f32 0.1, %v2598_v0  ;;  %v2632_v4 = vadd.f32 %v2629_v60, %v2623_v47 }
 0x35f   :  { %v2622_v6 = vadd.f32 %v2615_v61, %v2606_v3  ;;  %v2915_v8 = vmul.f32 -1.442695, %v2632_v4 }
 0x361   :  { %v2631_v9 = vadd.f32 %v2629_v60, %v2622_v6  ;;  %3357 = vpow2.f32 %v2915_v8 }
 0x363   :  { %v2914_v12 = vmul.f32 -1.442695, %v2631_v9 }
 0x365   :  { %3359 = vpow2.f32 %v2914_v12 }
 0x36b   :  { %v3358_v13 = vpop.eup %3357 }
 0x36c   :  { %v2640_v14 = vadd.f32 1.0, %v3358_v13 }
 0x36e   :  { %3361 = vrcp.f32 %v2640_v14 }
 0x36f   :  { %v3360_v15 = vpop.eup %3359 }
 0x370   :  { %v2639_v16 = vadd.f32 1.0, %v3360_v15 }
 0x372   :  { %3363 = vrcp.f32 %v2639_v16 }
 0x378   :  { %v3362_v17 = vpop.eup %3361 }
 0x379   :  { %v2647_v42 = vrot.slane %v3362_v17, 7 }
 0x37c   :  { %v3364_v57 = vpop.eup %3363 }
 0x37d   :  { %v2648_v18 = vsel %vm2507_vm2, %v2647_v42, %v3364_v57 }
 0x37e   :  { %2651 = vst.msk [vmem:[%s3723_s5] sm:$0x3] %vm2650_vm3, %v2648_v18 }
 0x37f   :  { %2656 = vsyncpa [#allocation3], 1 }
 0x380   :  { %2657 = vsyncpa [#allocation5], 1 }

</bundles_post_ra>
